<compile_context>
chip_gen: v7x
topology: tpu7x:2x2x1
jax: 0.10.0
libtpu: 0.0.40
codegen_flags: <defaults>
</compile_context>

<pallas_src>
import jax
import jax.numpy as jnp
from jax import lax
from jax.experimental import pallas as pl
from jax.experimental.pallas import tpu as pltpu


def make_resblock_kernel(H, W, Cin, Cout, eps=1e-5):
    HW = H * W
    PADL = HW + 2 * (W + 1)      # flat plane with a (W+1)-wide zero halo on each side
    Cmax = max(Cin, Cout)
    taps = [(kh - 1, kw - 1) for kh in range(3) for kw in range(3)]

    def kernel(x_ref, w1_ref, w2_ref, ws_ref, vecs_ref, p_ref, out_ref,
               pad_scr, patch_scr):
        # Zero ONLY the halo borders, once per body (the interior is fully overwritten
        # by each im2col call below; borders are never written again).
        zero_border = jnp.zeros((Cmax, W + 1), jnp.float32)
        pad_scr[:, 0:W + 1] = zero_border
        pad_scr[:, W + 1 + HW:PADL] = zero_border

        # column index of every flat pixel (masks horizontal wrap at row edges)
        col = lax.broadcasted_iota(jnp.int32, (1, HW), 1) % W
        keep_l = col >= 1          # valid positions for taps with dj == -1
        keep_r = col <= W - 2      # valid positions for taps with dj == +1

        def im2col(a, C):
            # write the plane lane-dense into the halo-padded flat buffer, then emit
            # the 9 shifted copies that form the (9*C, HW) im2col patch.
            pad_scr[0:C, W + 1:W + 1 + HW] = a
            for k, (di, dj) in enumerate(taps):
                off = (W + 1) + di * W + dj
                s = pad_scr[0:C, off:off + HW]        # shifted plane, full lane width
                if dj == -1:
                    s = jnp.where(keep_l, s, 0.0)
                elif dj == 1:
                    s = jnp.where(keep_r, s, 0.0)
                patch_scr[k * C:(k + 1) * C, :] = s
            return patch_scr[0:9 * C, :]              # (9*C, HW) im2col patch

        P = p_ref[...]    # (Cout, Cout) group-averaging matrix, includes 1/(cpg*HW)

        def group_norm(h, gamma, beta):
            # two-pass GroupNorm: lane-reduce first (XLU), then a tiny group-mix dot.
            s = jnp.sum(h, axis=1, keepdims=True)                       # (Cout, 1)
            mean_c = jnp.dot(P, s, preferred_element_type=jnp.float32)  # (Cout, 1)
            d = h - mean_c
            ss = jnp.sum(d * d, axis=1, keepdims=True)                  # (Cout, 1)
            var_c = jnp.dot(P, ss, preferred_element_type=jnp.float32)  # (Cout, 1)
            return d * (lax.rsqrt(var_c + eps) * gamma) + beta

        def silu(h):
            return h * jax.nn.sigmoid(h)               # sigmoid -> EUP slot

        x = x_ref[0]                                            # (Cin, HW) lane-dense
        b1, g1, be1 = vecs_ref[:, 0:1], vecs_ref[:, 1:2], vecs_ref[:, 2:3]
        b2, g2, be2 = vecs_ref[:, 3:4], vecs_ref[:, 4:5], vecs_ref[:, 5:6]
        bs = vecs_ref[:, 6:7]

        # conv1: single im2col matmul, K = 9*Cin
        h = jnp.dot(w1_ref[...], im2col(x, Cin),
                    preferred_element_type=jnp.float32) + b1
        h = silu(group_norm(h, g1, be1))

        # conv2: single im2col matmul, K = 9*Cout
        h = jnp.dot(w2_ref[...], im2col(h, Cout),
                    preferred_element_type=jnp.float32) + b2
        h = group_norm(h, g2, be2)

        # skip: 1x1 conv (nn.Identity handled via an identity matrix from the wrapper)
        identity = jnp.dot(ws_ref[...], x, preferred_element_type=jnp.float32) + bs

        out_ref[0] = silu(h + identity)                         # lane-dense store

    return kernel


def resblock_pallas(x_nchw, params, groups=8, eps=1e-5):
    B, Cin, H, W = x_nchw.shape
    Cout = params["w1"].shape[0]
    HW = H * W

    # NCHW-flat view: no transpose / pad copies of the activation in HBM.
    x = x_nchw.reshape(B, Cin, HW).astype(jnp.float32)

    # conv weights as (Cout, 9*C): column index = (kh*3 + kw)*C + ci (matches im2col).
    w1r = jnp.transpose(params["w1"], (0, 2, 3, 1)).reshape(Cout, 9 * Cin).astype(jnp.float32)
    w2r = jnp.transpose(params["w2"], (0, 2, 3, 1)).reshape(Cout, 9 * Cout).astype(jnp.float32)

    if params["ws"] is None:
        assert Cin == Cout, "identity skip requires in_channels == out_channels"
        ws = jnp.eye(Cout, dtype=jnp.float32)                    # nn.Identity skip
        bs = jnp.zeros((Cout,), jnp.float32)
    else:
        ws = params["ws"][:, :, 0, 0].astype(jnp.float32)        # (Cout, Cin)
        bs = params["bs"].astype(jnp.float32)

    # all per-channel vectors packed into one (Cout, 7) array: [b1,g1,be1,b2,g2,be2,bs]
    vecs = jnp.stack([params["b1"], params["g1"], params["be1"],
                      params["b2"], params["g2"], params["be2"], bs],
                     axis=1).astype(jnp.float32)

    # group-averaging matrix: P @ (per-channel lane sums) -> per-channel group mean.
    cpg = Cout // groups
    gid = jnp.arange(Cout) // cpg
    P = (gid[:, None] == gid[None, :]).astype(jnp.float32) / float(cpg * HW)

    Cmax = max(Cin, Cout)
    kernel = make_resblock_kernel(H, W, Cin, Cout, eps=eps)

    # TODO(synk): for production shapes (large H*W*C) tile H into row blocks with a
    # 1-row halo and set pltpu.CompilerParams(vmem_limit_bytes=...); whole-plane
    # blocks comfortably fit VMEM at these sizes.
    out = pl.pallas_call(
        kernel,
        out_shape=jax.ShapeDtypeStruct((B, Cout, HW), jnp.float32),
        grid_spec=pltpu.PrefetchScalarGridSpec(
            num_scalar_prefetch=0,
            grid=(B,),
            in_specs=[
                pl.BlockSpec((1, Cin, HW), lambda b: (b, 0, 0)),      # x (NCHW-flat)
                pl.BlockSpec((Cout, 9 * Cin), lambda b: (0, 0)),      # w1 (im2col layout)
                pl.BlockSpec((Cout, 9 * Cout), lambda b: (0, 0)),     # w2 (im2col layout)
                pl.BlockSpec((Cout, Cin), lambda b: (0, 0)),          # skip weight
                pl.BlockSpec((Cout, 7), lambda b: (0, 0)),            # packed per-chan vecs
                pl.BlockSpec((Cout, Cout), lambda b: (0, 0)),         # group-avg matrix P
            ],
            out_specs=pl.BlockSpec((1, Cout, HW), lambda b: (b, 0, 0)),
            scratch_shapes=[
                pltpu.VMEM((Cmax, HW + 2 * (W + 1)), jnp.float32),    # halo-padded plane
                pltpu.VMEM((9 * Cmax, HW), jnp.float32),              # im2col patch
            ],
        ),
        compiler_params=pltpu.CompilerParams(
            dimension_semantics=("parallel",)),   # batch is independent (v7x megacore)
    )(x, w1r, w2r, ws, vecs, P)

    return out.reshape(B, Cout, H, W)             # free metadata reshape (NCHW-flat)


# -------------------- pure-JAX reference (for verification) --------------------
def _conv2d_ref(x, w, b, padding):
    y = lax.conv_general_dilated(
        x, w, window_strides=(1, 1), padding=padding,
        dimension_numbers=("NCHW", "OIHW", "NCHW"),
        precision=lax.Precision.HIGHEST)
    return y + b[None, :, None, None]


def _group_norm_ref(x, gamma, beta, groups=8, eps=1e-5):
    N, C, H, W = x.shape
    xg = x.reshape(N, groups, (C // groups) * H * W)
    mean = xg.mean(axis=2, keepdims=True)
    var = ((xg - mean) ** 2).mean(axis=2, keepdims=True)
    xg = (xg - mean) / jnp.sqrt(var + eps)
    x = xg.reshape(N, C, H, W)
    return x * gamma[None, :, None, None] + beta[None, :, None, None]


def resblock_ref(x, p, groups=8, eps=1e-5):
    silu = lambda t: t * jax.nn.sigmoid(t)
    if p["ws"] is None:
        identity = x
    else:
        identity = _conv2d_ref(x, p["ws"], p["bs"], "VALID")
    h = _conv2d_ref(x, p["w1"], p["b1"], "SAME")
    h = silu(_group_norm_ref(h, p["g1"], p["be1"], groups, eps))
    h = _conv2d_ref(h, p["w2"], p["b2"], "SAME")
    h = _group_norm_ref(h, p["g2"], p["be2"], groups, eps)
    return silu(h + identity)


# ------------------------------------ main ------------------------------------
if __name__ == "__main__":
    key = jax.random.PRNGKey(0)
    ks = jax.random.split(key, 24)

    # case 1: Cin != Cout -> 1x1 conv skip
    B, Cin, Cout, H, W = 2, 4, 16, 16, 16   # Cout % 8 == 0 for GroupNorm(8, Cout)
    params = {
        "w1": 0.1 * jax.random.normal(ks[0], (Cout, Cin, 3, 3), jnp.float32),
        "b1": 0.1 * jax.random.normal(ks[1], (Cout,), jnp.float32),
        "g1": 1.0 + 0.1 * jax.random.normal(ks[2], (Cout,), jnp.float32),
        "be1": 0.1 * jax.random.normal(ks[3], (Cout,), jnp.float32),
        "w2": 0.1 * jax.random.normal(ks[4], (Cout, Cout, 3, 3), jnp.float32),
        "b2": 0.1 * jax.random.normal(ks[5], (Cout,), jnp.float32),
        "g2": 1.0 + 0.1 * jax.random.normal(ks[6], (Cout,), jnp.float32),
        "be2": 0.1 * jax.random.normal(ks[7], (Cout,), jnp.float32),
        "ws": 0.1 * jax.random.normal(ks[8], (Cout, Cin, 1, 1), jnp.float32),
        "bs": 0.1 * jax.random.normal(ks[9], (Cout,), jnp.float32),
    }
    x = jax.random.normal(ks[10], (B, Cin, H, W), jnp.float32)

    out = jax.block_until_ready(resblock_pallas(x, params))
    ref = jax.block_until_ready(resblock_ref(x, params))
    assert out.shape == (B, Cout, H, W), out.shape
    assert bool(jnp.all(jnp.isfinite(out)))
    assert bool(jnp.allclose(out, ref, atol=1e-2, rtol=1e-2)), float(
        jnp.max(jnp.abs(out - ref)))

    # case 2: Cin == Cout -> nn.Identity skip
    C2 = 16
    params2 = {
        "w1": 0.1 * jax.random.normal(ks[11], (C2, C2, 3, 3), jnp.float32),
        "b1": 0.1 * jax.random.normal(ks[12], (C2,), jnp.float32),
        "g1": 1.0 + 0.1 * jax.random.normal(ks[13], (C2,), jnp.float32),
        "be1": 0.1 * jax.random.normal(ks[14], (C2,), jnp.float32),
        "w2": 0.1 * jax.random.normal(ks[15], (C2, C2, 3, 3), jnp.float32),
        "b2": 0.1 * jax.random.normal(ks[16], (C2,), jnp.float32),
        "g2": 1.0 + 0.1 * jax.random.normal(ks[17], (C2,), jnp.float32),
        "be2": 0.1 * jax.random.normal(ks[18], (C2,), jnp.float32),
        "ws": None, "bs": None,
    }
    x2 = jax.random.normal(ks[19], (B, C2, H, W), jnp.float32)

    out2 = jax.block_until_ready(resblock_pallas(x2, params2))
    ref2 = jax.block_until_ready(resblock_ref(x2, params2))
    assert out2.shape == (B, C2, H, W), out2.shape
    assert bool(jnp.all(jnp.isfinite(out2)))
    assert bool(jnp.allclose(out2, ref2, atol=1e-2, rtol=1e-2)), float(
        jnp.max(jnp.abs(out2 - ref2)))

    print("KERNEL_OK")
</pallas_src>

<mosaic_0001>
module attributes {stable_mosaic.version = 11 : i64} {
  func.func @kernel(%arg0: i32, %arg1: memref<1x4x256xf32, #tpu.memory_space<vmem>>, %arg2: memref<16x36xf32, #tpu.memory_space<vmem>>, %arg3: memref<16x144xf32, #tpu.memory_space<vmem>>, %arg4: memref<16x4xf32, #tpu.memory_space<vmem>>, %arg5: memref<16x7xf32, #tpu.memory_space<vmem>>, %arg6: memref<16x16xf32, #tpu.memory_space<vmem>>, %arg7: memref<1x16x256xf32, #tpu.memory_space<vmem>>, %arg8: memref<16x290xf32, #tpu.memory_space<vmem>>, %arg9: memref<144x256xf32, #tpu.memory_space<vmem>>) attributes {dimension_semantics = [#tpu.dimension_semantics<parallel>], iteration_bounds = array<i64: 2>, scalar_prefetch = 0 : i64, scratch_operands = 2 : i64, tpu.core_type = #tpu.core_type<tc>, window_params = [{transform_indices = @transform_0, window_bounds = array<i64: 1, 4, 256>}, {pipeline_mode = #tpu.pipeline_mode<synchronous>, transform_indices = @transform_1, window_bounds = array<i64: 16, 36>}, {pipeline_mode = #tpu.pipeline_mode<synchronous>, transform_indices = @transform_2, window_bounds = array<i64: 16, 144>}, {pipeline_mode = #tpu.pipeline_mode<synchronous>, transform_indices = @transform_3, window_bounds = array<i64: 16, 4>}, {pipeline_mode = #tpu.pipeline_mode<synchronous>, transform_indices = @transform_4, window_bounds = array<i64: 16, 7>}, {pipeline_mode = #tpu.pipeline_mode<synchronous>, transform_indices = @transform_5, window_bounds = array<i64: 16, 16>}, {transform_indices = @transform_6, window_bounds = array<i64: 1, 16, 256>}]} {
    %cst = arith.constant 0.000000e+00 : f32
    %0 = vector.broadcast %cst : f32 to vector<16x17xf32>
    %c0 = arith.constant 0 : index
    %c0_0 = arith.constant 0 : index
    %1 = vector.load %arg8[%c0, %c0_0] : memref<16x290xf32, #tpu.memory_space<vmem>>, vector<16x17xf32>
    tpu.vector_store %arg8[%c0, %c0_0], %0 {strides = array<i32>} : memref<16x290xf32, #tpu.memory_space<vmem>>, vector<16x17xf32>,
    %c0_1 = arith.constant 0 : index
    %c273 = arith.constant 273 : index
    %2 = vector.load %arg8[%c0_1, %c273] : memref<16x290xf32, #tpu.memory_space<vmem>>, vector<16x17xf32>
    tpu.vector_store %arg8[%c0_1, %c273], %0 {strides = array<i32>} : memref<16x290xf32, #tpu.memory_space<vmem>>, vector<16x17xf32>,
    %3 = tpu.iota {dimensions = array<i32: 1>} : vector<1x256xi32>
    %c16_i32 = arith.constant 16 : i32
    %c0_i32 = arith.constant 0 : i32
    %4 = arith.cmpi eq, %c16_i32, %c0_i32 : i32
    %c1_i32 = arith.constant 1 : i32
    %5 = arith.select %4, %c1_i32, %c16_i32 : i32
    %6 = vector.broadcast %5 : i32 to vector<1x256xi32>
    %7 = arith.remsi %3, %6 : vector<1x256xi32>
    %c0_i32_2 = arith.constant 0 : i32
    %8 = vector.broadcast %c0_i32_2 : i32 to vector<1x256xi32>
    %9 = arith.cmpi ne, %7, %8 : vector<1x256xi32>
    %c0_i32_3 = arith.constant 0 : i32
    %10 = vector.broadcast %c0_i32_3 : i32 to vector<1x256xi32>
    %11 = arith.cmpi slt, %7, %10 : vector<1x256xi32>
    %c0_i32_4 = arith.constant 0 : i32
    %12 = arith.cmpi slt, %5, %c0_i32_4 : i32
    %13 = vector.broadcast %12 : i1 to vector<1x256xi1>
    %14 = vector.broadcast %13 : vector<1x256xi1> to vector<1x256xi1>
    %15 = arith.xori %11, %14 : vector<1x256xi1>
    %16 = arith.andi %15, %9 : vector<1x256xi1>
    %17 = vector.broadcast %5 : i32 to vector<1x256xi32>
    %18 = arith.addi %7, %17 : vector<1x256xi32>
    %19 = arith.select %16, %18, %7 : vector<1x256xi1>, vector<1x256xi32>
    %c1_i32_5 = arith.constant 1 : i32
    %20 = vector.broadcast %c1_i32_5 : i32 to vector<1x256xi32>
    %21 = arith.cmpi sge, %19, %20 : vector<1x256xi32>
    %c14_i32 = arith.constant 14 : i32
    %22 = vector.broadcast %c14_i32 : i32 to vector<1x256xi32>
    %23 = arith.cmpi sle, %19, %22 : vector<1x256xi32>
    %c0_6 = arith.constant 0 : index
    %c0_7 = arith.constant 0 : index
    %24 = vector.load %arg6[%c0_6, %c0_7] : memref<16x16xf32, #tpu.memory_space<vmem>>, vector<16x16xf32>
    %c0_8 = arith.constant 0 : index
    %c0_9 = arith.constant 0 : index
    %c0_10 = arith.constant 0 : index
    %25 = vector.load %arg1[%c0_8, %c0_9, %c0_10] : memref<1x4x256xf32, #tpu.memory_space<vmem>>, vector<1x4x256xf32>
    %26 = vector.shape_cast %25 : vector<1x4x256xf32> to vector<4x256xf32>
    %c0_11 = arith.constant 0 : index
    %c0_12 = arith.constant 0 : index
    %27 = vector.load %arg5[%c0_11, %c0_12] : memref<16x7xf32, #tpu.memory_space<vmem>>, vector<16x1xf32>
    %c0_13 = arith.constant 0 : index
    %c1 = arith.constant 1 : index
    %28 = vector.load %arg5[%c0_13, %c1] : memref<16x7xf32, #tpu.memory_space<vmem>>, vector<16x1xf32>
    %c0_14 = arith.constant 0 : index
    %c2 = arith.constant 2 : index
    %29 = vector.load %arg5[%c0_14, %c2] : memref<16x7xf32, #tpu.memory_space<vmem>>, vector<16x1xf32>
    %c0_15 = arith.constant 0 : index
    %c3 = arith.constant 3 : index
    %30 = vector.load %arg5[%c0_15, %c3] : memref<16x7xf32, #tpu.memory_space<vmem>>, vector<16x1xf32>
    %c0_16 = arith.constant 0 : index
    %c4 = arith.constant 4 : index
    %31 = vector.load %arg5[%c0_16, %c4] : memref<16x7xf32, #tpu.memory_space<vmem>>, vector<16x1xf32>
    %c0_17 = arith.constant 0 : index
    %c5 = arith.constant 5 : index
    %32 = vector.load %arg5[%c0_17, %c5] : memref<16x7xf32, #tpu.memory_space<vmem>>, vector<16x1xf32>
    %c0_18 = arith.constant 0 : index
    %c6 = arith.constant 6 : index
    %33 = vector.load %arg5[%c0_18, %c6] : memref<16x7xf32, #tpu.memory_space<vmem>>, vector<16x1xf32>
    %c0_19 = arith.constant 0 : index
    %c0_20 = arith.constant 0 : index
    %34 = vector.load %arg2[%c0_19, %c0_20] : memref<16x36xf32, #tpu.memory_space<vmem>>, vector<16x36xf32>
    %c0_21 = arith.constant 0 : index
    %c17 = arith.constant 17 : index
    %35 = vector.load %arg8[%c0_21, %c17] : memref<16x290xf32, #tpu.memory_space<vmem>>, vector<4x256xf32>
    tpu.vector_store %arg8[%c0_21, %c17], %26 {strides = array<i32>} : memref<16x290xf32, #tpu.memory_space<vmem>>, vector<4x256xf32>,
    %c0_22 = arith.constant 0 : index
    %c0_23 = arith.constant 0 : index
    %36 = vector.load %arg8[%c0_22, %c0_23] : memref<16x290xf32, #tpu.memory_space<vmem>>, vector<4x256xf32>
    %cst_24 = arith.constant 0.000000e+00 : f32
    %37 = vector.shape_cast %21 : vector<1x256xi1> to vector<1x256xi1>
    %38 = vector.broadcast %37 : vector<1x256xi1> to vector<4x256xi1>
    %39 = vector.broadcast %cst_24 : f32 to vector<4x256xf32>
    %40 = arith.select %38, %36, %39 : vector<4x256xi1>, vector<4x256xf32>
    %c0_25 = arith.constant 0 : index
    %c0_26 = arith.constant 0 : index
    %41 = vector.load %arg9[%c0_25, %c0_26] : memref<144x256xf32, #tpu.memory_space<vmem>>, vector<4x256xf32>
    tpu.vector_store %arg9[%c0_25, %c0_26], %40 {strides = array<i32>} : memref<144x256xf32, #tpu.memory_space<vmem>>, vector<4x256xf32>,
    %c0_27 = arith.constant 0 : index
    %c1_28 = arith.constant 1 : index
    %42 = vector.load %arg8[%c0_27, %c1_28] : memref<16x290xf32, #tpu.memory_space<vmem>>, vector<4x256xf32>
    %c4_29 = arith.constant 4 : index
    %c0_30 = arith.constant 0 : index
    %43 = vector.load %arg9[%c4_29, %c0_30] : memref<144x256xf32, #tpu.memory_space<vmem>>, vector<4x256xf32>
    tpu.vector_store %arg9[%c4_29, %c0_30], %42 {strides = array<i32>} : memref<144x256xf32, #tpu.memory_space<vmem>>, vector<4x256xf32>,
    %c0_31 = arith.constant 0 : index
    %c2_32 = arith.constant 2 : index
    %44 = vector.load %arg8[%c0_31, %c2_32] : memref<16x290xf32, #tpu.memory_space<vmem>>, vector<4x256xf32>
    %cst_33 = arith.constant 0.000000e+00 : f32
    %45 = vector.shape_cast %23 : vector<1x256xi1> to vector<1x256xi1>
    %46 = vector.broadcast %45 : vector<1x256xi1> to vector<4x256xi1>
    %47 = vector.broadcast %cst_33 : f32 to vector<4x256xf32>
    %48 = arith.select %46, %44, %47 : vector<4x256xi1>, vector<4x256xf32>
    %c8 = arith.constant 8 : index
    %c0_34 = arith.constant 0 : index
    %49 = vector.load %arg9[%c8, %c0_34] : memref<144x256xf32, #tpu.memory_space<vmem>>, vector<4x256xf32>
    tpu.vector_store %arg9[%c8, %c0_34], %48 {strides = array<i32>} : memref<144x256xf32, #tpu.memory_space<vmem>>, vector<4x256xf32>,
    %c0_35 = arith.constant 0 : index
    %c16 = arith.constant 16 : index
    %50 = vector.load %arg8[%c0_35, %c16] : memref<16x290xf32, #tpu.memory_space<vmem>>, vector<4x256xf32>
    %cst_36 = arith.constant 0.000000e+00 : f32
    %51 = vector.shape_cast %21 : vector<1x256xi1> to vector<1x256xi1>
    %52 = vector.broadcast %51 : vector<1x256xi1> to vector<4x256xi1>
    %53 = vector.broadcast %cst_36 : f32 to vector<4x256xf32>
    %54 = arith.select %52, %50, %53 : vector<4x256xi1>, vector<4x256xf32>
    %c12 = arith.constant 12 : index
    %c0_37 = arith.constant 0 : index
    %55 = vector.load %arg9[%c12, %c0_37] : memref<144x256xf32, #tpu.memory_space<vmem>>, vector<4x256xf32>
    tpu.vector_store %arg9[%c12, %c0_37], %54 {strides = array<i32>} : memref<144x256xf32, #tpu.memory_space<vmem>>, vector<4x256xf32>,
    %c0_38 = arith.constant 0 : index
    %c17_39 = arith.constant 17 : index
    %56 = vector.load %arg8[%c0_38, %c17_39] : memref<16x290xf32, #tpu.memory_space<vmem>>, vector<4x256xf32>
    %c16_40 = arith.constant 16 : index
    %c0_41 = arith.constant 0 : index
    %57 = vector.load %arg9[%c16_40, %c0_41] : memref<144x256xf32, #tpu.memory_space<vmem>>, vector<4x256xf32>
    tpu.vector_store %arg9[%c16_40, %c0_41], %56 {strides = array<i32>} : memref<144x256xf32, #tpu.memory_space<vmem>>, vector<4x256xf32>,
    %c0_42 = arith.constant 0 : index
    %c18 = arith.constant 18 : index
    %58 = vector.load %arg8[%c0_42, %c18] : memref<16x290xf32, #tpu.memory_space<vmem>>, vector<4x256xf32>
    %cst_43 = arith.constant 0.000000e+00 : f32
    %59 = vector.shape_cast %23 : vector<1x256xi1> to vector<1x256xi1>
    %60 = vector.broadcast %59 : vector<1x256xi1> to vector<4x256xi1>
    %61 = vector.broadcast %cst_43 : f32 to vector<4x256xf32>
    %62 = arith.select %60, %58, %61 : vector<4x256xi1>, vector<4x256xf32>
    %c20 = arith.constant 20 : index
    %c0_44 = arith.constant 0 : index
    %63 = vector.load %arg9[%c20, %c0_44] : memref<144x256xf32, #tpu.memory_space<vmem>>, vector<4x256xf32>
    tpu.vector_store %arg9[%c20, %c0_44], %62 {strides = array<i32>} : memref<144x256xf32, #tpu.memory_space<vmem>>, vector<4x256xf32>,
    %c0_45 = arith.constant 0 : index
    %c32 = arith.constant 32 : index
    %64 = vector.load %arg8[%c0_45, %c32] : memref<16x290xf32, #tpu.memory_space<vmem>>, vector<4x256xf32>
    %cst_46 = arith.constant 0.000000e+00 : f32
    %65 = vector.shape_cast %21 : vector<1x256xi1> to vector<1x256xi1>
    %66 = vector.broadcast %65 : vector<1x256xi1> to vector<4x256xi1>
    %67 = vector.broadcast %cst_46 : f32 to vector<4x256xf32>
    %68 = arith.select %66, %64, %67 : vector<4x256xi1>, vector<4x256xf32>
    %c24 = arith.constant 24 : index
    %c0_47 = arith.constant 0 : index
    %69 = vector.load %arg9[%c24, %c0_47] : memref<144x256xf32, #tpu.memory_space<vmem>>, vector<4x256xf32>
    tpu.vector_store %arg9[%c24, %c0_47], %68 {strides = array<i32>} : memref<144x256xf32, #tpu.memory_space<vmem>>, vector<4x256xf32>,
    %c0_48 = arith.constant 0 : index
    %c33 = arith.constant 33 : index
    %70 = vector.load %arg8[%c0_48, %c33] : memref<16x290xf32, #tpu.memory_space<vmem>>, vector<4x256xf32>
    %c28 = arith.constant 28 : index
    %c0_49 = arith.constant 0 : index
    %71 = vector.load %arg9[%c28, %c0_49] : memref<144x256xf32, #tpu.memory_space<vmem>>, vector<4x256xf32>
    tpu.vector_store %arg9[%c28, %c0_49], %70 {strides = array<i32>} : memref<144x256xf32, #tpu.memory_space<vmem>>, vector<4x256xf32>,
    %c0_50 = arith.constant 0 : index
    %c34 = arith.constant 34 : index
    %72 = vector.load %arg8[%c0_50, %c34] : memref<16x290xf32, #tpu.memory_space<vmem>>, vector<4x256xf32>
    %cst_51 = arith.constant 0.000000e+00 : f32
    %73 = vector.shape_cast %23 : vector<1x256xi1> to vector<1x256xi1>
    %74 = vector.broadcast %73 : vector<1x256xi1> to vector<4x256xi1>
    %75 = vector.broadcast %cst_51 : f32 to vector<4x256xf32>
    %76 = arith.select %74, %72, %75 : vector<4x256xi1>, vector<4x256xf32>
    %c32_52 = arith.constant 32 : index
    %c0_53 = arith.constant 0 : index
    %77 = vector.load %arg9[%c32_52, %c0_53] : memref<144x256xf32, #tpu.memory_space<vmem>>, vector<4x256xf32>
    tpu.vector_store %arg9[%c32_52, %c0_53], %76 {strides = array<i32>} : memref<144x256xf32, #tpu.memory_space<vmem>>, vector<4x256xf32>,
    %c0_54 = arith.constant 0 : index
    %c0_55 = arith.constant 0 : index
    %78 = vector.load %arg9[%c0_54, %c0_55] : memref<144x256xf32, #tpu.memory_space<vmem>>, vector<36x256xf32>
    %cst_56 = arith.constant dense<0.000000e+00> : vector<16x256xf32>
    %79 = tpu.matmul %34, %78, %cst_56 {dimension_numbers = #tpu.dot_dimension_numbers<[1], [0], [0], [1], [0, 0, 1, 1], [], []>} : vector<16x36xf32>, vector<36x256xf32>, vector<16x256xf32> -> vector<16x256xf32>
    %80 = vector.broadcast %27 : vector<16x1xf32> to vector<16x256xf32>
    %81 = arith.addf %79, %80 : vector<16x256xf32>
    %cst_57 = arith.constant dense<0.000000e+00> : vector<16xf32>
    %82 = vector.multi_reduction <add>, %81, %cst_57 [1] : vector<16x256xf32> to vector<16xf32>
    %83 = vector.shape_cast %82 : vector<16xf32> to vector<16x1xf32>
    %cst_58 = arith.constant dense<0.000000e+00> : vector<16x1xf32>
    %84 = tpu.matmul %24, %83, %cst_58 {dimension_numbers = #tpu.dot_dimension_numbers<[1], [0], [0], [1], [0, 0, 1, 1], [], []>} : vector<16x16xf32>, vector<16x1xf32>, vector<16x1xf32> -> vector<16x1xf32>
    %85 = vector.broadcast %84 : vector<16x1xf32> to vector<16x256xf32>
    %86 = arith.subf %81, %85 : vector<16x256xf32>
    %87 = arith.mulf %86, %86 : vector<16x256xf32>
    %cst_59 = arith.constant dense<0.000000e+00> : vector<16xf32>
    %88 = vector.multi_reduction <add>, %87, %cst_59 [1] : vector<16x256xf32> to vector<16xf32>
    %89 = vector.shape_cast %88 : vector<16xf32> to vector<16x1xf32>
    %cst_60 = arith.constant dense<0.000000e+00> : vector<16x1xf32>
    %90 = tpu.matmul %24, %89, %cst_60 {dimension_numbers = #tpu.dot_dimension_numbers<[1], [0], [0], [1], [0, 0, 1, 1], [], []>} : vector<16x16xf32>, vector<16x1xf32>, vector<16x1xf32> -> vector<16x1xf32>
    %cst_61 = arith.constant 9.99999974E-6 : f32
    %91 = vector.broadcast %cst_61 : f32 to vector<16x1xf32>
    %92 = arith.addf %90, %91 : vector<16x1xf32>
    %93 = math.rsqrt %92 : vector<16x1xf32>
    %94 = arith.mulf %93, %28 : vector<16x1xf32>
    %95 = vector.broadcast %94 : vector<16x1xf32> to vector<16x256xf32>
    %96 = arith.mulf %86, %95 : vector<16x256xf32>
    %97 = vector.broadcast %29 : vector<16x1xf32> to vector<16x256xf32>
    %98 = arith.addf %96, %97 : vector<16x256xf32>
    %99 = arith.negf %98 : vector<16x256xf32>
    %100 = math.exp %99 : vector<16x256xf32>
    %cst_62 = arith.constant 1.000000e+00 : f32
    %101 = vector.broadcast %cst_62 : f32 to vector<16x256xf32>
    %102 = arith.addf %101, %100 : vector<16x256xf32>
    %103 = arith.divf %101, %102 : vector<16x256xf32>
    %104 = arith.mulf %98, %103 : vector<16x256xf32>
    %c0_63 = arith.constant 0 : index
    %c0_64 = arith.constant 0 : index
    %105 = vector.load %arg3[%c0_63, %c0_64] : memref<16x144xf32, #tpu.memory_space<vmem>>, vector<16x144xf32>
    %c0_65 = arith.constant 0 : index
    %c17_66 = arith.constant 17 : index
    %106 = vector.load %arg8[%c0_65, %c17_66] : memref<16x290xf32, #tpu.memory_space<vmem>>, vector<16x256xf32>
    tpu.vector_store %arg8[%c0_65, %c17_66], %104 {strides = array<i32>} : memref<16x290xf32, #tpu.memory_space<vmem>>, vector<16x256xf32>,
    %c0_67 = arith.constant 0 : index
    %c0_68 = arith.constant 0 : index
    %107 = vector.load %arg8[%c0_67, %c0_68] : memref<16x290xf32, #tpu.memory_space<vmem>>, vector<16x256xf32>
    %cst_69 = arith.constant 0.000000e+00 : f32
    %108 = vector.shape_cast %21 : vector<1x256xi1> to vector<1x256xi1>
    %109 = vector.broadcast %108 : vector<1x256xi1> to vector<16x256xi1>
    %110 = vector.broadcast %cst_69 : f32 to vector<16x256xf32>
    %111 = arith.select %109, %107, %110 : vector<16x256xi1>, vector<16x256xf32>
    %c0_70 = arith.constant 0 : index
    %c0_71 = arith.constant 0 : index
    %112 = vector.load %arg9[%c0_70, %c0_71] : memref<144x256xf32, #tpu.memory_space<vmem>>, vector<16x256xf32>
    tpu.vector_store %arg9[%c0_70, %c0_71], %111 {strides = array<i32>} : memref<144x256xf32, #tpu.memory_space<vmem>>, vector<16x256xf32>,
    %c0_72 = arith.constant 0 : index
    %c1_73 = arith.constant 1 : index
    %113 = vector.load %arg8[%c0_72, %c1_73] : memref<16x290xf32, #tpu.memory_space<vmem>>, vector<16x256xf32>
    %c16_74 = arith.constant 16 : index
    %c0_75 = arith.constant 0 : index
    %114 = vector.load %arg9[%c16_74, %c0_75] : memref<144x256xf32, #tpu.memory_space<vmem>>, vector<16x256xf32>
    tpu.vector_store %arg9[%c16_74, %c0_75], %113 {strides = array<i32>} : memref<144x256xf32, #tpu.memory_space<vmem>>, vector<16x256xf32>,
    %c0_76 = arith.constant 0 : index
    %c2_77 = arith.constant 2 : index
    %115 = vector.load %arg8[%c0_76, %c2_77] : memref<16x290xf32, #tpu.memory_space<vmem>>, vector<16x256xf32>
    %cst_78 = arith.constant 0.000000e+00 : f32
    %116 = vector.shape_cast %23 : vector<1x256xi1> to vector<1x256xi1>
    %117 = vector.broadcast %116 : vector<1x256xi1> to vector<16x256xi1>
    %118 = vector.broadcast %cst_78 : f32 to vector<16x256xf32>
    %119 = arith.select %117, %115, %118 : vector<16x256xi1>, vector<16x256xf32>
    %c32_79 = arith.constant 32 : index
    %c0_80 = arith.constant 0 : index
    %120 = vector.load %arg9[%c32_79, %c0_80] : memref<144x256xf32, #tpu.memory_space<vmem>>, vector<16x256xf32>
    tpu.vector_store %arg9[%c32_79, %c0_80], %119 {strides = array<i32>} : memref<144x256xf32, #tpu.memory_space<vmem>>, vector<16x256xf32>,
    %c0_81 = arith.constant 0 : index
    %c16_82 = arith.constant 16 : index
    %121 = vector.load %arg8[%c0_81, %c16_82] : memref<16x290xf32, #tpu.memory_space<vmem>>, vector<16x256xf32>
    %cst_83 = arith.constant 0.000000e+00 : f32
    %122 = vector.shape_cast %21 : vector<1x256xi1> to vector<1x256xi1>
    %123 = vector.broadcast %122 : vector<1x256xi1> to vector<16x256xi1>
    %124 = vector.broadcast %cst_83 : f32 to vector<16x256xf32>
    %125 = arith.select %123, %121, %124 : vector<16x256xi1>, vector<16x256xf32>
    %c48 = arith.constant 48 : index
    %c0_84 = arith.constant 0 : index
    %126 = vector.load %arg9[%c48, %c0_84] : memref<144x256xf32, #tpu.memory_space<vmem>>, vector<16x256xf32>
    tpu.vector_store %arg9[%c48, %c0_84], %125 {strides = array<i32>} : memref<144x256xf32, #tpu.memory_space<vmem>>, vector<16x256xf32>,
    %c0_85 = arith.constant 0 : index
    %c17_86 = arith.constant 17 : index
    %127 = vector.load %arg8[%c0_85, %c17_86] : memref<16x290xf32, #tpu.memory_space<vmem>>, vector<16x256xf32>
    %c64 = arith.constant 64 : index
    %c0_87 = arith.constant 0 : index
    %128 = vector.load %arg9[%c64, %c0_87] : memref<144x256xf32, #tpu.memory_space<vmem>>, vector<16x256xf32>
    tpu.vector_store %arg9[%c64, %c0_87], %127 {strides = array<i32>} : memref<144x256xf32, #tpu.memory_space<vmem>>, vector<16x256xf32>,
    %c0_88 = arith.constant 0 : index
    %c18_89 = arith.constant 18 : index
    %129 = vector.load %arg8[%c0_88, %c18_89] : memref<16x290xf32, #tpu.memory_space<vmem>>, vector<16x256xf32>
    %cst_90 = arith.constant 0.000000e+00 : f32
    %130 = vector.shape_cast %23 : vector<1x256xi1> to vector<1x256xi1>
    %131 = vector.broadcast %130 : vector<1x256xi1> to vector<16x256xi1>
    %132 = vector.broadcast %cst_90 : f32 to vector<16x256xf32>
    %133 = arith.select %131, %129, %132 : vector<16x256xi1>, vector<16x256xf32>
    %c80 = arith.constant 80 : index
    %c0_91 = arith.constant 0 : index
    %134 = vector.load %arg9[%c80, %c0_91] : memref<144x256xf32, #tpu.memory_space<vmem>>, vector<16x256xf32>
    tpu.vector_store %arg9[%c80, %c0_91], %133 {strides = array<i32>} : memref<144x256xf32, #tpu.memory_space<vmem>>, vector<16x256xf32>,
    %c0_92 = arith.constant 0 : index
    %c32_93 = arith.constant 32 : index
    %135 = vector.load %arg8[%c0_92, %c32_93] : memref<16x290xf32, #tpu.memory_space<vmem>>, vector<16x256xf32>
    %cst_94 = arith.constant 0.000000e+00 : f32
    %136 = vector.shape_cast %21 : vector<1x256xi1> to vector<1x256xi1>
    %137 = vector.broadcast %136 : vector<1x256xi1> to vector<16x256xi1>
    %138 = vector.broadcast %cst_94 : f32 to vector<16x256xf32>
    %139 = arith.select %137, %135, %138 : vector<16x256xi1>, vector<16x256xf32>
    %c96 = arith.constant 96 : index
    %c0_95 = arith.constant 0 : index
    %140 = vector.load %arg9[%c96, %c0_95] : memref<144x256xf32, #tpu.memory_space<vmem>>, vector<16x256xf32>
    tpu.vector_store %arg9[%c96, %c0_95], %139 {strides = array<i32>} : memref<144x256xf32, #tpu.memory_space<vmem>>, vector<16x256xf32>,
    %c0_96 = arith.constant 0 : index
    %c33_97 = arith.constant 33 : index
    %141 = vector.load %arg8[%c0_96, %c33_97] : memref<16x290xf32, #tpu.memory_space<vmem>>, vector<16x256xf32>
    %c112 = arith.constant 112 : index
    %c0_98 = arith.constant 0 : index
    %142 = vector.load %arg9[%c112, %c0_98] : memref<144x256xf32, #tpu.memory_space<vmem>>, vector<16x256xf32>
    tpu.vector_store %arg9[%c112, %c0_98], %141 {strides = array<i32>} : memref<144x256xf32, #tpu.memory_space<vmem>>, vector<16x256xf32>,
    %c0_99 = arith.constant 0 : index
    %c34_100 = arith.constant 34 : index
    %143 = vector.load %arg8[%c0_99, %c34_100] : memref<16x290xf32, #tpu.memory_space<vmem>>, vector<16x256xf32>
    %cst_101 = arith.constant 0.000000e+00 : f32
    %144 = vector.shape_cast %23 : vector<1x256xi1> to vector<1x256xi1>
    %145 = vector.broadcast %144 : vector<1x256xi1> to vector<16x256xi1>
    %146 = vector.broadcast %cst_101 : f32 to vector<16x256xf32>
    %147 = arith.select %145, %143, %146 : vector<16x256xi1>, vector<16x256xf32>
    %c128 = arith.constant 128 : index
    %c0_102 = arith.constant 0 : index
    %148 = vector.load %arg9[%c128, %c0_102] : memref<144x256xf32, #tpu.memory_space<vmem>>, vector<16x256xf32>
    tpu.vector_store %arg9[%c128, %c0_102], %147 {strides = array<i32>} : memref<144x256xf32, #tpu.memory_space<vmem>>, vector<16x256xf32>,
    %c0_103 = arith.constant 0 : index
    %c0_104 = arith.constant 0 : index
    %149 = vector.load %arg9[%c0_103, %c0_104] : memref<144x256xf32, #tpu.memory_space<vmem>>, vector<144x256xf32>
    %cst_105 = arith.constant dense<0.000000e+00> : vector<16x256xf32>
    %150 = tpu.matmul %105, %149, %cst_105 {dimension_numbers = #tpu.dot_dimension_numbers<[1], [0], [0], [1], [0, 0, 1, 1], [], []>} : vector<16x144xf32>, vector<144x256xf32>, vector<16x256xf32> -> vector<16x256xf32>
    %151 = vector.broadcast %30 : vector<16x1xf32> to vector<16x256xf32>
    %152 = arith.addf %150, %151 : vector<16x256xf32>
    %cst_106 = arith.constant dense<0.000000e+00> : vector<16xf32>
    %153 = vector.multi_reduction <add>, %152, %cst_106 [1] : vector<16x256xf32> to vector<16xf32>
    %154 = vector.shape_cast %153 : vector<16xf32> to vector<16x1xf32>
    %cst_107 = arith.constant dense<0.000000e+00> : vector<16x1xf32>
    %155 = tpu.matmul %24, %154, %cst_107 {dimension_numbers = #tpu.dot_dimension_numbers<[1], [0], [0], [1], [0, 0, 1, 1], [], []>} : vector<16x16xf32>, vector<16x1xf32>, vector<16x1xf32> -> vector<16x1xf32>
    %156 = vector.broadcast %155 : vector<16x1xf32> to vector<16x256xf32>
    %157 = arith.subf %152, %156 : vector<16x256xf32>
    %158 = arith.mulf %157, %157 : vector<16x256xf32>
    %cst_108 = arith.constant dense<0.000000e+00> : vector<16xf32>
    %159 = vector.multi_reduction <add>, %158, %cst_108 [1] : vector<16x256xf32> to vector<16xf32>
    %160 = vector.shape_cast %159 : vector<16xf32> to vector<16x1xf32>
    %cst_109 = arith.constant dense<0.000000e+00> : vector<16x1xf32>
    %161 = tpu.matmul %24, %160, %cst_109 {dimension_numbers = #tpu.dot_dimension_numbers<[1], [0], [0], [1], [0, 0, 1, 1], [], []>} : vector<16x16xf32>, vector<16x1xf32>, vector<16x1xf32> -> vector<16x1xf32>
    %cst_110 = arith.constant 9.99999974E-6 : f32
    %162 = vector.broadcast %cst_110 : f32 to vector<16x1xf32>
    %163 = arith.addf %161, %162 : vector<16x1xf32>
    %164 = math.rsqrt %163 : vector<16x1xf32>
    %165 = arith.mulf %164, %31 : vector<16x1xf32>
    %166 = vector.broadcast %165 : vector<16x1xf32> to vector<16x256xf32>
    %167 = arith.mulf %157, %166 : vector<16x256xf32>
    %168 = vector.broadcast %32 : vector<16x1xf32> to vector<16x256xf32>
    %169 = arith.addf %167, %168 : vector<16x256xf32>
    %c0_111 = arith.constant 0 : index
    %c0_112 = arith.constant 0 : index
    %170 = vector.load %arg4[%c0_111, %c0_112] : memref<16x4xf32, #tpu.memory_space<vmem>>, vector<16x4xf32>
    %cst_113 = arith.constant dense<0.000000e+00> : vector<16x256xf32>
    %171 = tpu.matmul %170, %26, %cst_113 {dimension_numbers = #tpu.dot_dimension_numbers<[1], [0], [0], [1], [0, 0, 1, 1], [], []>} : vector<16x4xf32>, vector<4x256xf32>, vector<16x256xf32> -> vector<16x256xf32>
    %172 = vector.broadcast %33 : vector<16x1xf32> to vector<16x256xf32>
    %173 = arith.addf %171, %172 : vector<16x256xf32>
    %174 = arith.addf %169, %173 : vector<16x256xf32>
    %175 = arith.negf %174 : vector<16x256xf32>
    %176 = math.exp %175 : vector<16x256xf32>
    %cst_114 = arith.constant 1.000000e+00 : f32
    %177 = vector.broadcast %cst_114 : f32 to vector<16x256xf32>
    %178 = arith.addf %177, %176 : vector<16x256xf32>
    %179 = arith.divf %177, %178 : vector<16x256xf32>
    %180 = arith.mulf %174, %179 : vector<16x256xf32>
    %c0_115 = arith.constant 0 : index
    %c0_116 = arith.constant 0 : index
    %c0_117 = arith.constant 0 : index
    %181 = vector.load %arg7[%c0_115, %c0_116, %c0_117] : memref<1x16x256xf32, #tpu.memory_space<vmem>>, vector<1x16x256xf32>
    %182 = vector.shape_cast %181 : vector<1x16x256xf32> to vector<16x256xf32>
    %183 = vector.shape_cast %180 : vector<16x256xf32> to vector<1x16x256xf32>
    tpu.vector_store %arg7[%c0_115, %c0_116, %c0_117], %183 {strides = array<i32>} : memref<1x16x256xf32, #tpu.memory_space<vmem>>, vector<1x16x256xf32>,
    return
  }
  func.func @transform_0(%arg0: i32) -> (i32, i32, i32) {
    %c0_i32 = arith.constant 0 : i32
    %c0_i32_0 = arith.constant 0 : i32
    %c0_i32_1 = arith.constant 0 : i32
    return %arg0, %c0_i32, %c0_i32_0 : i32, i32, i32
  }
  func.func @transform_1(%arg0: i32) -> (i32, i32) {
    %c0_i32 = arith.constant 0 : i32
    %c0_i32_0 = arith.constant 0 : i32
    %c0_i32_1 = arith.constant 0 : i32
    return %c0_i32, %c0_i32_0 : i32, i32
  }
  func.func @transform_2(%arg0: i32) -> (i32, i32) {
    %c0_i32 = arith.constant 0 : i32
    %c0_i32_0 = arith.constant 0 : i32
    %c0_i32_1 = arith.constant 0 : i32
    return %c0_i32, %c0_i32_0 : i32, i32
  }
  func.func @transform_3(%arg0: i32) -> (i32, i32) {
    %c0_i32 = arith.constant 0 : i32
    %c0_i32_0 = arith.constant 0 : i32
    %c0_i32_1 = arith.constant 0 : i32
    return %c0_i32, %c0_i32_0 : i32, i32
  }
  func.func @transform_4(%arg0: i32) -> (i32, i32) {
    %c0_i32 = arith.constant 0 : i32
    %c0_i32_0 = arith.constant 0 : i32
    %c0_i32_1 = arith.constant 0 : i32
    return %c0_i32, %c0_i32_0 : i32, i32
  }
  func.func @transform_5(%arg0: i32) -> (i32, i32) {
    %c0_i32 = arith.constant 0 : i32
    %c0_i32_0 = arith.constant 0 : i32
    %c0_i32_1 = arith.constant 0 : i32
    return %c0_i32, %c0_i32_0 : i32, i32
  }
  func.func @transform_6(%arg0: i32) -> (i32, i32, i32) {
    %c0_i32 = arith.constant 0 : i32
    %c0_i32_0 = arith.constant 0 : i32
    %c0_i32_1 = arith.constant 0 : i32
    return %arg0, %c0_i32, %c0_i32_0 : i32, i32, i32
  }
}

</mosaic_0001>

<bundles_post_ra>
// kernel: tpu_custom_call.1
= control target key start
LH: loop header
LB: loop body
LE: loop exit
PB: predicated region body
PF: predicated region fallthrough
CT: control target
= control target key end

     0   :  { %11 = vsyncpa [#allocation5], 0  ;;  %s2902_s0 = inlined_call_operand.vmem [shape: f32[2,4,256], index: 0, kind: input, shape index: {}]   ;;  %s2903_s1 = inlined_call_operand.hbm [shape: f32[16,36], index: 1, kind: input, shape index: {}]   ;;  %s2904_s2 = inlined_call_operand.vmem [shape: f32[16,144], index: 2, kind: input, shape index: {}]   ;;  %s2905_s3 = inlined_call_operand.vmem [shape: f32[16,4], index: 3, kind: input, shape index: {}]   ;;  %s2906_s4 = inlined_call_operand.vmem [shape: f32[16,7], index: 4, kind: input, shape index: {}]   ;;  %s2907_s5 = inlined_call_operand.hbm [shape: f32[16,16], index: 5, kind: input, shape index: {}]   ;;  %s2908_s6 = inlined_call_operand.hbm [shape: f32[2,16,256], index: 6, kind: output, shape index: {}]  }
   0x1   :  { %12 = vsyncpa [#allocation8], 0 }
   0x2   :  { %13 = vsyncpa [#allocation6], 0 }
   0x3   :  { %15 = vsyncpa [#allocation6 + $0x1], 0  ;;  %s2326_s21 = smov 0   ;;  %s2328_s22 = smov 0  }
   0x4   :  { %s2330_s23 = smov 0   ;;  %s2332_s24 = smov 0  }
   0x5 LB: > { %s2347_s25 = sadd.s32 4294967295, %s2266_s24   ;;  %s1821_s26 = sadd.s32 4294967294, %s2266_s24   ;;  %s2266_s24 = sphi %s2332_s24, %s2942_s24   ;;  %s2262_s23 = sphi %s2330_s23, %s2941_s23   ;;  %s2258_s22 = sphi %s2328_s22, %s2940_s22   ;;  %s2254_s21 = sphi %s2326_s21, %s2939_s21  }
   0x6   : > { %s2351_s27 = sadd.s32 1, %s2266_s24   ;;  %s159_s28 = sadd.s32 1, %s2262_s23 }
   0x7   : > { %s156_s29 = ssub.s32 %s2266_s24, %s2351_s27  ;;  %p169_p0 = scmp.ne.s32.totalorder %s2262_s23, %s2258_s22 }
   0x8   : > { %p157_p1 = scmp.eq.s32.totalorder %s156_s29, 0  ;;  %p170_p2 = scmp.eq.s32.totalorder %s2347_s25, 1 }
   0x9   : > { %p175_p3 = scmp.ne.s32.totalorder %s2258_s22, %s2254_s21  ;;  %p176_p4 = scmp.eq.s32.totalorder %s1821_s26, 1 }
   0xa   : > { %s2362_s30 = scalar_select %p157_p1, %s2262_s23, %s159_s28  }
   0xb   : > { %p2364_p5 = por %p170_p2, %p169_p0  ;;  %p2368_p6 = por %p176_p4, %p175_p3 }
   0xc   : > { %p1822_p7 = scmp.ge.s32.totalorder %s2266_s24, 1  ;;  %p183_p8 = scmp.lt.s32.totalorder %s2266_s24, 3 }
   0xd   : > { %s2912_s7 = scalar_select %p2364_p5, 1, 0 }
   0xe   : > { %s2913_s8 = scalar_select %p2368_p6, 1, 0 }
   0xf   : > { %p2909_p9 = scmp.eq.s32.totalorder %s2347_s25, 0  ;;  %p2375_p10 = pnand %p1822_p7, %p183_p8 }
  0x10   : > { %s2268_s10 = smov [#allocation4]   ;;  %s2269_s13 = smov [#allocation7]  }
  0x11   : > { %s2914_s9 = scalar_select %p2375_p10, 1, 0 }
  0x12   : > { %s195_s11 = sshll.u32 %s2268_s10, 4  ;;  %p1979_p11 = pneg %p2375_p10  ;;  %s196_s11 = int_to_ptr.vmem [resolvable:$true] %s195_s11 }
  0x13   : > { %s217_s14 = sshll.u32 %s2269_s13, 4  ;;  %s2140_s17 = scalar_lea.hbm %s2903_s1, 256  ;;  %s2387_s14 = int_to_ptr.vmem [resolvable:$true] %s217_s14 }
  0x14   : > { %p2383_p12 = pnand %p2909_p9, %p1979_p11  ;;  %p2141_p13 = scmp.ne.s32.totalorder %s2903_s1, %s2140_s17 }
  0x15   : > { %p2147_p3 = scmp.lt.u32.totalorder %s2140_s17, %s2903_s1 }
  0x16   : > { %p2142_p0 = pneg %p2383_p12 }
  0x18   : > { %p2143_p1 = pnand %p2142_p0, %p2141_p13 }
  0x1a   : > { %p2144_p2 = pneg %p2143_p1 }
  0x1c   : > { %p2149_p4 = pnand %p2147_p3, %p2144_p2 }
  0x1e   : > { %2152 = shalt.err (!%p2149_p4)
}
  0x1f   : > { %s2153_s28 = scalar_lea.vmem %s196_s11, 256  ;;  %p2161_p9 = scmp.lt.s32.totalorder %s196_s11, %s196_s11 }
  0x20   : > { %p2154_p7 = scmp.ne.s32.totalorder %s196_s11, %s2153_s28  ;;  %p2162_p6 = scmp.lt.s32.totalorder %s2153_s28, %s2153_s28 }
  0x22   : > { %p2156_p8 = pnand %p2154_p7, %p2142_p0  ;;  %p2163_p5 = por %p2162_p6, %p2161_p9 }
  0x24   : > { %p2157_p11 = pneg %p2156_p8 }
  0x26   : > { %p2164_p10 = pnand %p2163_p5, %p2157_p11 }
  0x28   : > { %2167 = shalt.err (!%p2164_p10)
}
  0x29   : > { %s2270_s29 = smov 128   ;;  %s2271_s10 = smov 8  }
  0x2a   : > { %1982 = dma.hbm_to_vmem [thread:$0]  (!%p2383_p12), %s2903_s1, 256, %s196_s11, [#allocation5], %s2270_s29, %s2270_s29, %s2271_s10  }
  0x2b   : > { %s2168_s18 = scalar_lea.hbm %s2907_s5, 256 }
  0x2c   : > { %p2169_p13 = scmp.ne.s32.totalorder %s2907_s5, %s2168_s18  ;;  %p2175_p9 = scmp.lt.u32.totalorder %s2168_s18, %s2907_s5 }
  0x2e   : > { %p2171_p5 = pnand %p2169_p13, %p2142_p0 }
  0x30   : > { %p2172_p6 = pneg %p2171_p5 }
  0x32   : > { %p2177_p10 = pnand %p2175_p9, %p2172_p6 }
  0x34   : > { %2180 = shalt.err (!%p2177_p10)
}
  0x35   : > { %s2181_s11 = scalar_lea.vmem %s2387_s14, 256  ;;  %p2189_p4 = scmp.lt.s32.totalorder %s2387_s14, %s2387_s14 }
  0x36   : > { %p2182_p1 = scmp.ne.s32.totalorder %s2387_s14, %s2181_s11  ;;  %p2190_p7 = scmp.lt.s32.totalorder %s2181_s11, %s2181_s11 }
  0x38   : > { %p2184_p2 = pnand %p2182_p1, %p2142_p0  ;;  %p2191_p8 = por %p2190_p7, %p2189_p4 }
  0x3a   : > { %p2185_p3 = pneg %p2184_p2 }
  0x3c   : > { %p2192_p11 = pnand %p2191_p8, %p2185_p3 }
  0x3e   : > { %2195 = shalt.err (!%p2192_p11)
}
  0x3f   : > { %1985 = dma.hbm_to_vmem [thread:$0]  (!%p2383_p12), %s2907_s5, 256, %s2387_s14, [#allocation8], %s2270_s29, %s2270_s29, %s2271_s10  }
  0x40   : > { %p2916_p13 = scmp.ne.s32.totalorder %s2914_s9, 0 }
  0x41   : > { %p2917_p5 = scmp.eq.s32.totalorder (!%p2916_p13), %s2347_s25, 0 }
  0x42   : > { %241 = sbr.rel (%p2916_p13) target bundleno = 3260 (0xcbc), region = 44 }
  0x49   : > { %2241 = dma.done.wait (%p2917_p5), [#allocation5], 256   ;;  %p2918_p0 = pmov %p2917_p5 }
  0x4b   : > { %2243 = vsyncadd (%p2918_p0), [#allocation5], 4294967040  ;;  %p2919_p6 = pmov %p2918_p0 }
  0x4c   : > { %p2920_p9 = pmov %p2918_p0 }
  0x4d   : > { %2245 = dma.done.wait (%p2919_p6), [#allocation8], 256  }
  0x4e   : > { %2247 = vsyncadd (%p2920_p9), [#allocation8], 4294967040  ;;  %p275_p10 = scmp.lt.s32.totalorder %s2347_s25, 1  ;;  %vm280_vm0 = vcmask 138240   ;;  %v2272_v0 = vmov 0.0   ;;  %vm283_vm1 = vcmask 277640   ;;  %v286_v3 = vlaneseq }
  0x4f   : > { %281 = vst.msk [vmem:[#allocation2] sm:$0xff] %vm280_vm0, %v2272_v0  ;;  %282 = vst.msk [vmem:[#allocation2 + $0x18] sm:$0xff] %vm280_vm0, %v2272_v0  ;;  %631 = vmatprep.mubr.f32.mxu0 %v2272_v0  ;;  %s2273_s16 = smov 17   ;;  %vm334_vm2 = vcmask 1043592   ;;  %vm337_vm3 = vcmask 134144   ;;  %s2274_s17 = smov 112  }
  0x50   : > { %s276_s9 = scalar_select %p275_p10, %s2347_s25, 1  ;;  %284 = vst.msk [vmem:[#allocation2 + $0x10] sm:$0xff] %vm283_vm1, %v2272_v0  ;;  %285 = vst.msk [vmem:[#allocation2 + $0x28] sm:$0xff] %vm283_vm1, %v2272_v0  ;;  %v2466_v4 = vand.u32 127, %v286_v3  ;;  %v2517_v47 = vld [vmem:[%s2906_s4] sm:$0xff]  ;;  %v2522_v48 = vld [vmem:[%s2906_s4 + $0x8] sm:$0xff] }
  0x51   : > { %s2275_s18 = smov 126   ;;  %s2276_s19 = smov 96   ;;  %v2282_v49 = vmov 0   ;;  %vm481_vm6 = vcmask 785408   ;;  %vm408_vm7 = vcmask 916480   ;;  %vm435_vm8 = vcmask 908288  }
  0x52   : > { %s1863_s12 = sshll.u32 %s276_s9, 3  ;;  %v293_v6 = vand.u32 15, %v2466_v4  ;;  %v2471_v9 = vadd.s32 128, %v2466_v4  ;;  %s2277_s20 = smov 110   ;;  %2049 = vset.pattern.permute.xlu0 %v2282_v49  ;;  %2050 = vset.pattern.permute.xlu1 %v2282_v49  ;;  %vm387_vm9 = vcmask 1031168   ;;  %vm454_vm12 = vcmask 900096  }
  0x53   : > { %s2458_s10 = scalar_lea.vmem %s2902_s0, %s1863_s12  ;;  %s2278_s26 = smov 111   ;;  %vm364_vm13 = vcmask 1039360   ;;  %vm505_vm14 = vcmask 777216   ;;  %vm524_vm15 = vcmask 769024   ;;  %vm560_vm1 = vcmask 1043456   ;;  %v896_v20 = vld [vmem:[%s2904_s2 + $0x8] sm:$0xff] }
  0x54   : > { %v319_v1 = vld [vmem:[%s2458_s10] sm:$0xff]  ;;  %vm2475_vm4 = vcmp.ge.s32.totalorder %v293_v6, 1  ;;  %v300_v14 = vand.u32 15, %v2471_v9  ;;  %s2279_s28 = smov 127   ;;  %s2280_s11 = smov 95   ;;  %vm2544_vm10 = vcmp.le.s32.totalorder %v293_v6, 14 }
  0x55   : > { %326 = vrot.lane.b32.xlu0 %v319_v1, %s2273_s16  ;;  %v2462_v2 = vcombine.high %v319_v1, %v319_v1  ;;  %s2281_s13 = smov 94   ;;  %s2285_s15 = smov 124  }
  0x56   : > { %vm2488_vm5 = vcmp.ge.s32.totalorder %v300_v14, 1  ;;  %vm2550_vm11 = vcmp.le.s32.totalorder %v300_v14, 14  ;;  %p2937_p1 = scmp.ne.s32.totalorder %s2912_s7, 0  ;;  %s2288_s9 = smov [#allocation9]  }
  0x57   : > { %s2200_s12 = sshll.u32 %s2288_s9, 4  ;;  %s2201_s12 = int_to_ptr.vmem [resolvable:$false] %s2200_s12 }
  0x58   : > { %s2202_s14 = scalar_lea.vmem %s2201_s12, 1024 }
  0x59   : > { %328 = vrot.lane.b32.xlu0 %v2462_v2, %s2273_s16 }
  0xc7   : > { %v327_v5 = vpop.permute.xlu0 %326 }
  0xc8   : > { %335 = vst.msk [vmem:[#allocation2] sm:$0xf] %vm334_vm2, %v327_v5  ;;  %vm553_vm2 = vcmask 293888  }
  0xcb   : > { %v329_v7 = vpop.permute.xlu0 %328 }
  0xcc   : > { %v330_v8 = vsel %vm280_vm0, %v327_v5, %v329_v7  ;;  %338 = vst.msk [vmem:[#allocation2 + $0x10] sm:$0xf] %vm337_vm3, %v329_v7  ;;  %vm650_vm3 = vcmask 130048  }
  0xcd   : > { %336 = vst [vmem:[#allocation2 + $0x8] sm:$0xf] %v330_v8  ;;  %1844 = vmatprep.mubr.msk.f32.mxu1 %vm650_vm3, %v896_v20 }
  0xcf   : > { %v339_v11 = vld [vmem:[#allocation2] sm:$0xf] }
  0xd0   : > { %v396_v12 = vld [vmem:[#allocation2] sm:$0xf]  ;;  %v345_v15 = vsel %vm2475_vm4, %v339_v11, 0.0 }
  0xd1   : > { %v371_v13 = vld [vmem:[#allocation2] sm:$0xf]  ;;  %402 = vrot.lane.b32.xlu0 %v396_v12, %s2274_s17  ;;  %347 = vst [vmem:[#allocation3] sm:$0xf] %v345_v15 }
  0xd2   : > { %381 = vrot.lane.b32.xlu1 %v371_v13, %s2275_s18  ;;  %v469_v16 = vld [vmem:[#allocation2] sm:$0xf] }
  0xd3   : > { %v442_v17 = vld [vmem:[#allocation2] sm:$0xf]  ;;  %v373_v18 = vld [vmem:[#allocation2 + $0x10] sm:$0xf] }
  0xd4   : > { %v340_v19 = vld [vmem:[#allocation2 + $0x8] sm:$0xf]  ;;  %v423_v21 = vld [vmem:[#allocation2] sm:$0xf]  ;;  %v398_v23 = vld [vmem:[#allocation2 + $0x10] sm:$0xf] }
  0xd5   : > { %475 = vrot.lane.b32.xlu0 %v469_v16, %s2276_s19  ;;  %v349_v22 = vld [vmem:[#allocation2] sm:$0xf]  ;;  %v346_v24 = vsel %vm2488_vm5, %v340_v19, 0.0  ;;  %v471_v26 = vld [vmem:[#allocation2 + $0x10] sm:$0xf] }
  0xd6   : > { %448 = vrot.lane.b32.xlu1 %v442_v17, %s2277_s20  ;;  %v355_v25 = vrot.slane %v349_v22, 4  ;;  %348 = vst [vmem:[#allocation3 + $0x8] sm:$0xf] %v346_v24  ;;  %v444_v27 = vld [vmem:[#allocation2 + $0x10] sm:$0xf] }
  0xd7   : > { %v425_v28 = vld [vmem:[#allocation2 + $0x10] sm:$0xf]  ;;  %v470_v29 = vld [vmem:[#allocation2 + $0x8] sm:$0xf]  ;;  %v490_v39 = vld [vmem:[#allocation2] sm:$0xf] }
  0xd8   : > { %v397_v30 = vld [vmem:[#allocation2 + $0x8] sm:$0xf]  ;;  %v351_v32 = vld [vmem:[#allocation2 + $0x10] sm:$0xf]  ;;  %v496_v41 = vrot.slane %v490_v39, 4 }
  0xd9   : > { %385 = vrot.lane.b32.xlu0 %v373_v18, %s2275_s18  ;;  %v424_v31 = vld [vmem:[#allocation2 + $0x8] sm:$0xf]  ;;  %v357_v33 = vrot.slane %v351_v32, 4  ;;  %v492_v35 = vld [vmem:[#allocation2 + $0x10] sm:$0xf] }
  0xda   : > { %429 = vrot.lane.b32.xlu1 %v423_v21, %s2278_s26  ;;  %v372_v34 = vld [vmem:[#allocation2 + $0x8] sm:$0xf]  ;;  %v498_v36 = vrot.slane %v492_v35, 4  ;;  %v514_v44 = vld [vmem:[#allocation2 + $0x10] sm:$0xf] }
  0xdb   : > { %v443_v37 = vld [vmem:[#allocation2 + $0x8] sm:$0xf]  ;;  %v512_v46 = vld [vmem:[#allocation2] sm:$0xf] }
  0xdc   : > { %v350_v38 = vld [vmem:[#allocation2 + $0x8] sm:$0xf] }
  0xdd   : > { %358 = vrot.lane.b32.xlu0 %v355_v25, %s2279_s28  ;;  %v356_v40 = vrot.slane %v350_v38, 4  ;;  %v491_v42 = vld [vmem:[#allocation2 + $0x8] sm:$0xf] }
  0xde   : > { %406 = vrot.lane.b32.xlu1 %v398_v23, %s2274_s17  ;;  %v497_v43 = vrot.slane %v491_v42, 4  ;;  %v513_v45 = vld [vmem:[#allocation2 + $0x8] sm:$0xf] }
  0xe1   : > { %452 = vrot.lane.b32.xlu0 %v444_v27, %s2277_s20 }
  0xe2   : > { %479 = vrot.lane.b32.xlu1 %v471_v26, %s2276_s19 }
  0xe5   : > { %477 = vrot.lane.b32.xlu0 %v470_v29, %s2276_s19 }
  0xe6   : > { %433 = vrot.lane.b32.xlu1 %v425_v28, %s2278_s26 }
  0xe9   : > { %431 = vrot.lane.b32.xlu0 %v424_v31, %s2278_s26 }
  0xea   : > { %404 = vrot.lane.b32.xlu1 %v397_v30, %s2274_s17 }
  0xed   : > { %362 = vrot.lane.b32.xlu0 %v357_v33, %s2279_s28 }
  0xee   : > { %383 = vrot.lane.b32.xlu1 %v372_v34, %s2275_s18 }
  0xf1   : > { %503 = vrot.lane.b32.xlu0 %v498_v36, %s2280_s11 }
  0xf2   : > { %450 = vrot.lane.b32.xlu1 %v443_v37, %s2277_s20 }
  0xf5   : > { %499 = vrot.lane.b32.xlu0 %v496_v41, %s2280_s11 }
  0xf6   : > { %360 = vrot.lane.b32.xlu1 %v356_v40, %s2279_s28 }
  0xf9   : > { %522 = vrot.lane.b32.xlu0 %v514_v44, %s2281_s13 }
  0xfa   : > { %501 = vrot.lane.b32.xlu1 %v497_v43, %s2280_s11 }
  0xfd   : > { %545 = vperm.xlu0 %2049, %v2517_v47  }
  0xfe   : > { %520 = vrot.lane.b32.xlu1 %v513_v45, %s2281_s13 }
 0x102   : > { %518 = vrot.lane.b32.xlu1 %v512_v46, %s2281_s13 }
 0x106   : > { %550 = vperm.xlu1 %2050, %v2522_v48  }
 0x143   : > { %v403_v50 = vpop.permute.xlu0 %402 }
 0x144   : > { %v382_v51 = vpop.permute.xlu1 %381 }
 0x147   : > { %v476_v52 = vpop.permute.xlu0 %475 }
 0x148   : > { %v449_v53 = vpop.permute.xlu1 %448 }
 0x14b   : > { %v386_v54 = vpop.permute.xlu0 %385 }
 0x14c   : > { %v430_v55 = vpop.permute.xlu1 %429 }
 0x14f   : > { %v359_v57 = vpop.permute.xlu0 %358 }
 0x150   : > { %v407_v56 = vpop.permute.xlu1 %406 }
 0x153   : > { %v453_v59 = vpop.permute.xlu0 %452 }
 0x154   : > { %v480_v58 = vpop.permute.xlu1 %479 }
 0x157   : > { %v478_v61 = vpop.permute.xlu0 %477 }
 0x158   : > { %v434_v60 = vpop.permute.xlu1 %433  ;;  %v482_v62 = vsel %vm481_vm6, %v476_v52, %v478_v61  ;;  %v483_v63 = vsel %vm481_vm6, %v478_v61, %v480_v58 }
 0x159   : > { %v486_v1 = vsel %vm2475_vm4, %v482_v62, 0.0  ;;  %v487_v3 = vsel %vm2488_vm5, %v483_v63, 0.0  ;;  %v322_v62 = vld [vmem:[#allocation4] sm:$0xff] }
 0x15a   : > { %488 = vst [vmem:[#allocation3 + $0x30] sm:$0xf] %v486_v1  ;;  %489 = vst [vmem:[#allocation3 + $0x38] sm:$0xf] %v487_v3  ;;  %v323_v1 = vld [vmem:[#allocation4 + $0x8] sm:$0xff] }
 0x15b   : > { %v432_v7 = vpop.permute.xlu0 %431 }
 0x15c   : > { %v405_v5 = vpop.permute.xlu1 %404  ;;  %v436_v12 = vsel %vm435_vm8, %v430_v55, %v432_v7  ;;  %v437_v13 = vsel %vm435_vm8, %v432_v7, %v434_v60 }
 0x15d   : > { %v409_v8 = vsel %vm408_vm7, %v403_v50, %v405_v5  ;;  %v410_v11 = vsel %vm408_vm7, %v405_v5, %v407_v56  ;;  %440 = vst [vmem:[#allocation3 + $0x20] sm:$0xf] %v436_v12  ;;  %441 = vst [vmem:[#allocation3 + $0x28] sm:$0xf] %v437_v13 }
 0x15e   : > { %v413_v15 = vsel %vm2475_vm4, %v409_v8, 0.0  ;;  %v414_v16 = vsel %vm2488_vm5, %v410_v11, 0.0 }
 0x15f   : > { %v417_v17 = vrot.slane %v413_v15, 4  ;;  %v418_v18 = vrot.slane %v414_v16, 4  ;;  %v363_v23 = vpop.permute.xlu0 %362 }
 0x160   : > { %v384_v22 = vpop.permute.xlu1 %383 }
 0x161   : > { %421 = vst [vmem:[#allocation3 + $0x10] sm:$0xf0] %v417_v17  ;;  %422 = vst [vmem:[#allocation3 + $0x18] sm:$0xf0] %v418_v18  ;;  %v388_v24 = vsel %vm387_vm9, %v382_v51, %v384_v22  ;;  %v389_v25 = vsel %vm387_vm9, %v384_v22, %v386_v54 }
 0x162   : > { %v392_v4 = vsel %vm2544_vm10, %v388_v24, 0.0  ;;  %v393_v6 = vsel %vm2550_vm11, %v389_v25, 0.0 }
 0x163   : > { %394 = vst [vmem:[#allocation3 + $0x10] sm:$0xf] %v392_v4  ;;  %395 = vst [vmem:[#allocation3 + $0x18] sm:$0xf] %v393_v6  ;;  %v504_v14 = vpop.permute.xlu0 %503  ;;  %v2583_v6 = vld [vmem:[#allocation7 + $0x8] sm:$0xff] }
 0x164   : > { %v451_v9 = vpop.permute.xlu1 %450 }
 0x165   : > { %v455_v26 = vsel %vm454_vm12, %v449_v53, %v451_v9  ;;  %v456_v27 = vsel %vm454_vm12, %v451_v9, %v453_v59 }
 0x166   : > { %v459_v28 = vsel %vm2544_vm10, %v455_v26, 0.0  ;;  %v460_v29 = vsel %vm2550_vm11, %v456_v27, 0.0 }
 0x167   : > { %v463_v30 = vrot.slane %v459_v28, 4  ;;  %v464_v31 = vrot.slane %v460_v29, 4  ;;  %v500_v35 = vpop.permute.xlu0 %499 }
 0x168   : > { %v361_v32 = vpop.permute.xlu1 %360 }
 0x169   : > { %467 = vst [vmem:[#allocation3 + $0x20] sm:$0xf0] %v463_v30  ;;  %468 = vst [vmem:[#allocation3 + $0x28] sm:$0xf0] %v464_v31  ;;  %v365_v33 = vsel %vm364_vm13, %v359_v57, %v361_v32  ;;  %v366_v34 = vsel %vm364_vm13, %v361_v32, %v363_v23  ;;  %v2579_v23 = vld [vmem:[#allocation7] sm:$0xff] }
 0x16a   : > { %369 = vst [vmem:[#allocation3] sm:$0xf0] %v365_v33  ;;  %370 = vst [vmem:[#allocation3 + $0x8] sm:$0xf0] %v366_v34  ;;  %v536_v41 = vld [vmem:[#allocation3 + $0x18] sm:$0xff]  ;;  %v535_v45 = vld [vmem:[#allocation3 + $0x10] sm:$0xff] }
 0x16b   : > { %v523_v39 = vpop.permute.xlu0 %522 }
 0x16c   : > { %v502_v36 = vpop.permute.xlu1 %501 }
 0x16d   : > { %v506_v37 = vsel %vm505_vm14, %v500_v35, %v502_v36  ;;  %v507_v38 = vsel %vm505_vm14, %v502_v36, %v504_v14 }
 0x16e   : > { %510 = vst [vmem:[#allocation3 + $0x30] sm:$0xf0] %v506_v37  ;;  %511 = vst [vmem:[#allocation3 + $0x38] sm:$0xf0] %v507_v38 }
 0x170   : > { %v521_v40 = vpop.permute.xlu1 %520  ;;  %v538_v53 = vld [vmem:[#allocation3 + $0x28] sm:$0xff]  ;;  %v537_v56 = vld [vmem:[#allocation3 + $0x20] sm:$0xff] }
 0x171   : > { %v526_v42 = vsel %vm524_vm15, %v521_v40, %v523_v39  ;;  %v534_v43 = vld [vmem:[#allocation3 + $0x8] sm:$0xff]  ;;  %v533_v44 = vld [vmem:[#allocation3] sm:$0xff] }
 0x172   : > { %v530_v46 = vsel %vm2550_vm11, %v526_v42, 0.0  ;;  %v1909_v50 = vpack.c.bf16 %v536_v41, %v534_v43  ;;  %v1911_v51 = vpack.c.bf16 %v535_v45, %v533_v44 }
 0x173   : > { %532 = vst [vmem:[#allocation3 + $0x48] sm:$0xf] %v530_v46 }
 0x174   : > { %v519_v52 = vpop.permute.xlu1 %518  ;;  %1910 = vmatprep.subr.bf16.mxu0 %v1909_v50 }
 0x175   : > { %v525_v54 = vsel %vm524_vm15, %v519_v52, %v521_v40  ;;  %1912 = vmatpush1.bf16.msra.mxu0 %v1911_v51  ;;  %v540_v55 = vld [vmem:[#allocation3 + $0x38] sm:$0xff]  ;;  %v539_v57 = vld [vmem:[#allocation3 + $0x30] sm:$0xff] }
 0x176   : > { %v529_v58 = vsel %vm2544_vm10, %v525_v54, 0.0  ;;  %v1913_v59 = vpack.c.bf16 %v540_v55, %v538_v53  ;;  %v1915_v60 = vpack.c.bf16 %v539_v57, %v537_v56  ;;  %v2283_v54 = vmov 2  }
 0x177   : > { %531 = vst [vmem:[#allocation3 + $0x40] sm:$0xf] %v529_v58 }
 0x178   : > { %1914 = vmatprep.subr.bf16.mxu0 %v1913_v59 }
 0x179   : > { %1916 = vmatpush1.bf16.msra.mxu0 %v1915_v60 }
 0x17a   : > { %v542_v61 = vld [vmem:[#allocation3 + $0x48] sm:$0xf] }
 0x17b   : > { %1832 = vmatprep.subr.msk.mxu0 %vm560_vm1, %v542_v61 }
 0x17c   : > { %v546_v3 = vpop.permute.xlu0 %545 }
 0x17e   : > { %v541_v63 = vld [vmem:[#allocation3 + $0x40] sm:$0xf] }
 0x17f   : > { %1833 = vmatpush1.msk.msra.mxu0 %vm560_vm1, %v541_v63 }
 0x180   : > { %1834 = vmatmul.mubr.msk.f32.vlgmr.msra.gmra.mrb[0].mxu0 %vm553_vm2, %v322_v62 }
 0x181   : > { %637 = vmatprep.mubr.f32.mxu0 %v2272_v0 }
 0x184   : > { %1835 = vmatmul.mubr.msk.f32.gmra.mrb[2].mxu0 %vm553_vm2, %v323_v1  ;;  %vm919_vm2 = vcmask 1047688  }
 0x185   : > { %v551_v12 = vpop.permute.xlu1 %550  ;;  %1885 = vmatprep.mubr.msk.f32.mxu0 %vm650_vm3, %v2579_v23 }
 0x253   : > { %v633_v5 = vpop.f32.mrb[0].mxu0 }
 0x254   : > { %v634_v7 = vadd.f32 %v633_v5, %v546_v3  ;;  %v635_v8 = vpop.f32.mrb[1].mxu0 }
 0x255   : > { %v636_v11 = vadd.f32 %v635_v8, %v546_v3 }
 0x257   : > { %v639_v13 = vpop.f32.mrb[2].mxu0  ;;  %v644_v15 = vadd.f32 %v636_v11, %v634_v7 }
 0x258   : > { %v640_v16 = vadd.f32 %v639_v13, %v551_v12  ;;  %v641_v17 = vpop.f32.mrb[3].mxu0 }
 0x259   : > { %v642_v18 = vadd.f32 %v641_v17, %v551_v12  ;;  %645 = vadd.xlane.f32.xlu1 %v644_v15 }
 0x25b   : > { %v647_v22 = vadd.f32 %v642_v18, %v640_v16 }
 0x25d   : > { %648 = vadd.xlane.f32.xlu0 %v647_v22 }
 0x2e6   : > { %v646_v24 = vpop.xlane.xlu1 %645 }
 0x2ea   : > { %v649_v25 = vpop.xlane.xlu0 %648 }
 0x2eb   : > { %v1917_v4 = vpack.c.bf16 %v649_v25, %v646_v24 }
 0x2ed   : > { %1918 = vmatprep.subr.bf16.mxu0 %v1917_v4 }
 0x2ee   : > { %1920 = vmatpush3.bf16.msra.mxu0 %v1917_v4 }
 0x2f1   : > { %1886 = vmatmul.mubr.msk.f32.vlgmr.msra.gmra.mrb[4].mxu0 %vm650_vm3, %v2583_v6 }
 0x2f2   : > { %1892 = vmatprep.mubr.msk.f32.mxu0 %vm650_vm3, %v2579_v23 }
 0x3c4   : > { %v1887_v9 = vpop.f32.mrb[4].mxu0 }
 0x3c5   : > { %739 = vperm.xlu1 %2050, %v1887_v9   ;;  %v723_v14 = vpop.f32.mrb[5].mxu0 }
 0x3c6   : > { %734 = vperm.xlu0 %2049, %v723_v14  }
 0x444   : > { %v740_v26 = vpop.permute.xlu1 %739 }
 0x445   : > { %v744_v27 = vsub.f32 %v640_v16, %v740_v26  ;;  %v745_v28 = vsub.f32 %v642_v18, %v740_v26  ;;  %v735_v29 = vpop.permute.xlu0 %734 }
 0x446   : > { %v742_v30 = vsub.f32 %v634_v7, %v735_v29  ;;  %v743_v31 = vsub.f32 %v636_v11, %v735_v29 }
 0x447   : > { %v748_v32 = vmul.f32 %v744_v27, %v744_v27  ;;  %v749_v33 = vmul.f32 %v745_v28, %v745_v28 }
 0x448   : > { %v746_v34 = vmul.f32 %v742_v30, %v742_v30  ;;  %v747_v35 = vmul.f32 %v743_v31, %v743_v31 }
 0x449   : > { %v753_v36 = vadd.f32 %v749_v33, %v748_v32 }
 0x44a   : > { %v750_v37 = vadd.f32 %v747_v35, %v746_v34 }
 0x44b   : > { %754 = vadd.xlane.f32.xlu0 %v753_v36 }
 0x44c   : > { %751 = vadd.xlane.f32.xlu1 %v750_v37 }
 0x45d   : > { %835 = vrot.lane.b32.xlu1 %v2522_v48, %s2279_s28 }
 0x461   : > { %833 = vrot.lane.b32.xlu0 %v2517_v47, %s2279_s28 }
 0x4d8   : > { %v755_v38 = vpop.xlane.xlu0 %754 }
 0x4d9   : > { %v752_v39 = vpop.xlane.xlu1 %751 }
 0x4da   : > { %v1921_v40 = vpack.c.bf16 %v755_v38, %v752_v39 }
 0x4dc   : > { %1922 = vmatprep.subr.bf16.mxu0 %v1921_v40  ;;  %v834_v46 = vpop.permute.xlu0 %833 }
 0x4dd   : > { %1924 = vmatpush3.bf16.msra.mxu0 %v1921_v40  ;;  %v836_v45 = vpop.permute.xlu1 %835 }
 0x4e0   : > { %1893 = vmatmul.mubr.msk.f32.vlgmr.msra.gmra.mrb[6].mxu0 %vm650_vm3, %v2583_v6 }
 0x4e1   : > { %1899 = vmatprep.mubr.msk.f32.mxu0 %vm650_vm3, %v2579_v23 }
 0x5b3   : > { %v1894_v41 = vpop.f32.mrb[6].mxu0 }
 0x5b4   : > { %v828_v42 = vadd.f32 1e-05, %v1894_v41  ;;  %v822_v43 = vpop.f32.mrb[7].mxu0 }
 0x5b5   : > { %v823_v44 = vadd.f32 1e-05, %v822_v43 }
 0x5b6   : > { %2061 = vrsqrt.f32 %v828_v42 }
 0x5b7   : > { %2063 = vrsqrt.f32 %v823_v44 }
 0x5c0   : > { %v2062_v50 = vpop.eup %2061 }
 0x5c1   : > { %v2064_v51 = vpop.eup %2063  ;;  %v840_v52 = vmul.f32 %v2062_v50, %v836_v45 }
 0x5c2   : > { %v839_v53 = vmul.f32 %v2064_v51, %v834_v46  ;;  %v2284_v51 = vmov 3  }
 0x5c3   : > { %848 = vperm.xlu0 %2049, %v840_v52  }
 0x5c4   : > { %843 = vperm.xlu1 %2050, %v839_v53  }
 0x5c7   : > { %2052 = vset.pattern.permute.xlu0 %v2283_v54 }
 0x5c8   : > { %860 = vperm.xlu0 %2052, %v2522_v48   ;;  %2051 = vset.pattern.permute.xlu1 %v2283_v54 }
 0x5c9   : > { %856 = vperm.xlu1 %2051, %v2517_v47  }
 0x5cc   : > { %2053 = vset.pattern.permute.xlu0 %v2284_v51 }
 0x5cd   : > { %2054 = vset.pattern.permute.xlu1 %v2284_v51 }
 0x642   : > { %v849_v55 = vpop.permute.xlu0 %848 }
 0x643   : > { %v844_v56 = vpop.permute.xlu1 %843  ;;  %v853_v57 = vmul.f32 %v849_v55, %v744_v27  ;;  %v854_v58 = vmul.f32 %v849_v55, %v745_v28 }
 0x644   : > { %v851_v59 = vmul.f32 %v844_v56, %v742_v30  ;;  %v852_v60 = vmul.f32 %v844_v56, %v743_v31 }
 0x647   : > { %v861_v61 = vpop.permute.xlu0 %860 }
 0x648   : > { %v865_v62 = vadd.f32 %v861_v61, %v853_v57  ;;  %v866_v63 = vadd.f32 %v861_v61, %v854_v58  ;;  %v857_v1 = vpop.permute.xlu1 %856 }
 0x649   : > { %v863_v3 = vadd.f32 %v857_v1, %v851_v59  ;;  %v864_v5 = vadd.f32 %v857_v1, %v852_v60 }
 0x64a   : > { %v1842_v7 = vmul.f32 -1.442695, %v865_v62  ;;  %v1843_v8 = vmul.f32 -1.442695, %v866_v63 }
 0x64b   : > { %v1840_v11 = vmul.f32 -1.442695, %v863_v3  ;;  %v1841_v12 = vmul.f32 -1.442695, %v864_v5 }
 0x64c   : > { %2065 = vpow2.f32 %v1842_v7 }
 0x64d   : > { %2067 = vpow2.f32 %v1843_v8 }
 0x64e   : > { %2069 = vpow2.f32 %v1840_v11 }
 0x64f   : > { %2071 = vpow2.f32 %v1841_v12 }
 0x656   : > { %v2066_v13 = vpop.eup %2065 }
 0x657   : > { %v2068_v15 = vpop.eup %2067  ;;  %v881_v16 = vadd.f32 1.0, %v2066_v13 }
 0x658   : > { %v2070_v17 = vpop.eup %2069  ;;  %v882_v18 = vadd.f32 1.0, %v2068_v15 }
 0x659   : > { %v2072_v22 = vpop.eup %2071  ;;  %2073 = vrcp.f32 %v881_v16  ;;  %v879_v24 = vadd.f32 1.0, %v2070_v17 }
 0x65a   : > { %2075 = vrcp.f32 %v882_v18  ;;  %v880_v25 = vadd.f32 1.0, %v2072_v22 }
 0x65b   : > { %2077 = vrcp.f32 %v879_v24 }
 0x65c   : > { %2079 = vrcp.f32 %v880_v25 }
 0x663   : > { %v2074_v4 = vpop.eup %2073 }
 0x664   : > { %v2076_v9 = vpop.eup %2075  ;;  %v893_v14 = vmul.f32 %v2074_v4, %v865_v62 }
 0x665   : > { %v894_v26 = vmul.f32 %v2076_v9, %v866_v63  ;;  %v2078_v27 = vpop.eup %2077 }
 0x666   : > { %907 = vrot.lane.b32.xlu0 %v893_v14, %s2273_s16  ;;  %v891_v28 = vmul.f32 %v2078_v27, %v863_v3  ;;  %v2080_v29 = vpop.eup %2079 }
 0x667   : > { %909 = vrot.lane.b32.xlu1 %v894_v26, %s2273_s16  ;;  %v892_v30 = vmul.f32 %v2080_v29, %v864_v5 }
 0x66b   : > { %903 = vrot.lane.b32.xlu1 %v891_v28, %s2273_s16 }
 0x66f   : > { %905 = vrot.lane.b32.xlu1 %v892_v30, %s2273_s16 }
 0x6d8   : > { %v908_v31 = vpop.permute.xlu0 %907 }
 0x6d9   : > { %v910_v32 = vpop.permute.xlu1 %909  ;;  %923 = vst.msk [vmem:[#allocation2 + $0x18] sm:$0xff] %vm919_vm2, %v908_v31 }
 0x6da   : > { %925 = vst.msk [vmem:[#allocation2 + $0x28] sm:$0xff] %vm280_vm0, %v910_v32  ;;  %v912_v33 = vsel %vm280_vm0, %v908_v31, %v910_v32 }
 0x6db   : > { %v933_v34 = vsel %vm2488_vm5, %v912_v33, 0.0  ;;  %958 = vrot.lane.b32.xlu0 %v912_v33, %s2279_s28 }
 0x6dc   : > { %937 = vst [vmem:[#allocation3 + $0x18] sm:$0xff] %v933_v34 }
 0x6dd   : > { %v904_v35 = vpop.permute.xlu1 %903 }
 0x6de   : > { %920 = vst.msk [vmem:[#allocation2] sm:$0xff] %vm919_vm2, %v904_v35  ;;  %vm2635_vm2 = vmpackc.low %vm2475_vm4, %vm2475_vm4 }
 0x6e0   : > { %v2608_v36 = vld [vmem:[#allocation2 + $0x18] sm:$0xff] }
 0x6e1   : > { %v932_v37 = vsel %vm2475_vm4, %v2608_v36, 0.0  ;;  %v906_v38 = vpop.permute.xlu1 %905  ;;  %v943_v39 = vld [vmem:[#allocation2 + $0x28] sm:$0xff] }
 0x6e2   : > { %936 = vst [vmem:[#allocation3 + $0x10] sm:$0xff] %v932_v37  ;;  %v911_v40 = vsel %vm280_vm0, %v904_v35, %v906_v38  ;;  %922 = vst.msk [vmem:[#allocation2 + $0x10] sm:$0xff] %vm280_vm0, %v906_v38  ;;  %960 = vrot.lane.b32.xlu1 %v943_v39, %s2279_s28 }
 0x6e3   : > { %921 = vst [vmem:[#allocation2 + $0x8] sm:$0xff] %v911_v40  ;;  %v931_v41 = vsel %vm2488_vm5, %v911_v40, 0.0  ;;  %vm2626_vm0 = vmpackc.low %vm2488_vm5, %vm2488_vm5  ;;  %v2105_v45 = vpack.c.bf16 %v912_v33, %v911_v40 }
 0x6e4   : > { %935 = vst [vmem:[#allocation3 + $0x8] sm:$0xff] %v931_v41  ;;  %vm2763_vm5 = vmpackc.low %vm2544_vm10, %vm2544_vm10 }
 0x6e5   : > { %v938_v42 = vld [vmem:[#allocation2] sm:$0xff]  ;;  %2106 = vmatprep.subr.msk.bf16.mxu1 %vm2626_vm0, %v2105_v45 }
 0x6e6   : > { %956 = vrot.lane.b32.xlu1 %v2608_v36, %s2279_s28  ;;  %950 = vrot.lane.b32.xlu0 %v938_v42, %s2279_s28  ;;  %v930_v43 = vsel %vm2475_vm4, %v938_v42, 0.0  ;;  %v2108_v50 = vpack.c.bf16 %v2608_v36, %v938_v42  ;;  %vm2754_vm4 = vmpackc.low %vm2550_vm11, %vm2550_vm11 }
 0x6e7   : > { %934 = vst [vmem:[#allocation3] sm:$0xff] %v930_v43 }
 0x6e8   : > { %2109 = vmatpush1.bf16.msk.msra.mxu1 %vm2635_vm2, %v2108_v50 }
 0x6e9   : > { %v940_v10 = vld [vmem:[#allocation2 + $0x10] sm:$0xff] }
 0x6ea   : > { %996 = vrot.lane.b32.xlu1 %v943_v39, %s2275_s18  ;;  %994 = vrot.lane.b32.xlu0 %v912_v33, %s2275_s18 }
 0x6ee   : > { %992 = vrot.lane.b32.xlu1 %v2608_v36, %s2275_s18  ;;  %986 = vrot.lane.b32.xlu0 %v938_v42, %s2275_s18 }
 0x6f2   : > { %1036 = vrot.lane.b32.xlu1 %v943_v39, %s2274_s17  ;;  %1034 = vrot.lane.b32.xlu0 %v912_v33, %s2274_s17 }
 0x6f6   : > { %1032 = vrot.lane.b32.xlu1 %v2608_v36, %s2274_s17  ;;  %1026 = vrot.lane.b32.xlu0 %v938_v42, %s2274_s17 }
 0x6fa   : > { %1076 = vrot.lane.b32.xlu1 %v943_v39, %s2278_s26  ;;  %1074 = vrot.lane.b32.xlu0 %v912_v33, %s2278_s26 }
 0x6fe   : > { %1072 = vrot.lane.b32.xlu1 %v2608_v36, %s2278_s26  ;;  %1066 = vrot.lane.b32.xlu0 %v938_v42, %s2278_s26 }
 0x702   : > { %1112 = vrot.lane.b32.xlu1 %v943_v39, %s2277_s20  ;;  %1110 = vrot.lane.b32.xlu0 %v912_v33, %s2277_s20 }
 0x706   : > { %1108 = vrot.lane.b32.xlu1 %v2608_v36, %s2277_s20  ;;  %1102 = vrot.lane.b32.xlu0 %v938_v42, %s2277_s20 }
 0x70a   : > { %1152 = vrot.lane.b32.xlu1 %v943_v39, %s2276_s19  ;;  %1150 = vrot.lane.b32.xlu0 %v912_v33, %s2276_s19 }
 0x70e   : > { %1148 = vrot.lane.b32.xlu1 %v2608_v36, %s2276_s19  ;;  %1142 = vrot.lane.b32.xlu0 %v938_v42, %s2276_s19 }
 0x712   : > { %1192 = vrot.lane.b32.xlu1 %v943_v39, %s2280_s11  ;;  %1190 = vrot.lane.b32.xlu0 %v912_v33, %s2280_s11 }
 0x716   : > { %1188 = vrot.lane.b32.xlu1 %v2608_v36, %s2280_s11  ;;  %1182 = vrot.lane.b32.xlu0 %v938_v42, %s2280_s11 }
 0x71a   : > { %1228 = vrot.lane.b32.xlu1 %v943_v39, %s2281_s13  ;;  %1226 = vrot.lane.b32.xlu0 %v912_v33, %s2281_s13 }
 0x71e   : > { %954 = vrot.lane.b32.xlu1 %v940_v10, %s2279_s28  ;;  %952 = vrot.lane.b32.xlu0 %v911_v40, %s2279_s28 }
 0x722   : > { %990 = vrot.lane.b32.xlu1 %v940_v10, %s2275_s18  ;;  %988 = vrot.lane.b32.xlu0 %v911_v40, %s2275_s18 }
 0x726   : > { %1030 = vrot.lane.b32.xlu1 %v940_v10, %s2274_s17  ;;  %1028 = vrot.lane.b32.xlu0 %v911_v40, %s2274_s17 }
 0x72a   : > { %1070 = vrot.lane.b32.xlu1 %v940_v10, %s2278_s26  ;;  %1068 = vrot.lane.b32.xlu0 %v911_v40, %s2278_s26  ;;  %s1864_s26 = sshll.u32 %s2347_s25, 9 }
 0x72e   : > { %1106 = vrot.lane.b32.xlu1 %v940_v10, %s2277_s20  ;;  %1104 = vrot.lane.b32.xlu0 %v911_v40, %s2277_s20 }
 0x732   : > { %1146 = vrot.lane.b32.xlu1 %v940_v10, %s2276_s19  ;;  %1144 = vrot.lane.b32.xlu0 %v911_v40, %s2276_s19 }
 0x736   : > { %1186 = vrot.lane.b32.xlu1 %v940_v10, %s2280_s11  ;;  %1184 = vrot.lane.b32.xlu0 %v911_v40, %s2280_s11 }
 0x73a   : > { %1222 = vrot.lane.b32.xlu1 %v940_v10, %s2281_s13  ;;  %1220 = vrot.lane.b32.xlu0 %v911_v40, %s2281_s13 }
 0x73e   : > { %1224 = vrot.lane.b32.xlu1 %v2608_v36, %s2281_s13  ;;  %1218 = vrot.lane.b32.xlu0 %v938_v42, %s2281_s13  ;;  %s2859_s13 = scalar_lea.hbm %s2908_s6, %s1864_s26 }
 0x742   : > { %1283 = vperm.xlu0 %2053, %v2517_v47   ;;  %1287 = vperm.xlu1 %2054, %v2522_v48  }
 0x746   : > { %2056 = vset.pattern.permute.xlu1 %v2282_v49  ;;  %2055 = vset.pattern.permute.xlu0 %v2282_v49 }
 0x74d   : > { %v959_v53 = vpop.permute.xlu0 %958 }
 0x754   : > { %v961_v52 = vpop.permute.xlu1 %960 }
 0x755   : > { %v965_v54 = vsel %vm364_vm13, %v959_v53, %v961_v52 }
 0x756   : > { %973 = vst [vmem:[#allocation3 + $0x38] sm:$0xff] %v965_v54 }
 0x758   : > { %v957_v55 = vpop.permute.xlu1 %956  ;;  %v951_v56 = vpop.permute.xlu0 %950 }
 0x759   : > { %v964_v57 = vsel %vm364_vm13, %v957_v55, %v959_v53 }
 0x75a   : > { %972 = vst [vmem:[#allocation3 + $0x30] sm:$0xff] %v964_v57 }
 0x75c   : > { %v997_v58 = vpop.permute.xlu1 %996  ;;  %v995_v59 = vpop.permute.xlu0 %994 }
 0x75d   : > { %v1001_v47 = vsel %vm387_vm9, %v995_v59, %v997_v58 }
 0x760   : > { %v993_v60 = vpop.permute.xlu1 %992  ;;  %v987_v48 = vpop.permute.xlu0 %986 }
 0x761   : > { %v1000_v61 = vsel %vm387_vm9, %v993_v60, %v995_v59 }
 0x764   : > { %v1037_v62 = vpop.permute.xlu1 %1036  ;;  %v1035_v49 = vpop.permute.xlu0 %1034 }
 0x765   : > { %v2706_v63 = vsel %vm408_vm7, %v1035_v49, %v1037_v62 }
 0x768   : > { %v1033_v1 = vpop.permute.xlu1 %1032  ;;  %v1027_v3 = vpop.permute.xlu0 %1026 }
 0x769   : > { %v2709_v5 = vsel %vm408_vm7, %v1033_v1, %v1035_v49 }
 0x76c   : > { %v1077_v7 = vpop.permute.xlu1 %1076  ;;  %v1075_v8 = vpop.permute.xlu0 %1074 }
 0x76d   : > { %v2712_v11 = vsel %vm435_vm8, %v1075_v8, %v1077_v7 }
 0x770   : > { %v1073_v12 = vpop.permute.xlu1 %1072  ;;  %v1067_v13 = vpop.permute.xlu0 %1066 }
 0x771   : > { %v2715_v15 = vsel %vm435_vm8, %v1073_v12, %v1075_v8 }
 0x774   : > { %v1113_v16 = vpop.permute.xlu1 %1112  ;;  %v1111_v17 = vpop.permute.xlu0 %1110 }
 0x775   : > { %v2718_v18 = vsel %vm454_vm12, %v1111_v17, %v1113_v16 }
 0x778   : > { %v1109_v22 = vpop.permute.xlu1 %1108  ;;  %v1103_v24 = vpop.permute.xlu0 %1102 }
 0x779   : > { %v2721_v25 = vsel %vm454_vm12, %v1109_v22, %v1111_v17 }
 0x77c   : > { %v1153_v4 = vpop.permute.xlu1 %1152  ;;  %v1151_v9 = vpop.permute.xlu0 %1150 }
 0x77d   : > { %v2724_v14 = vsel %vm481_vm6, %v1151_v9, %v1153_v4 }
 0x780   : > { %v1149_v26 = vpop.permute.xlu1 %1148  ;;  %v1143_v27 = vpop.permute.xlu0 %1142 }
 0x781   : > { %v2727_v28 = vsel %vm481_vm6, %v1149_v26, %v1151_v9 }
 0x784   : > { %v1193_v29 = vpop.permute.xlu1 %1192  ;;  %v1191_v30 = vpop.permute.xlu0 %1190 }
 0x785   : > { %v2730_v31 = vsel %vm505_vm14, %v1191_v30, %v1193_v29 }
 0x788   : > { %v1189_v32 = vpop.permute.xlu1 %1188  ;;  %v1183_v33 = vpop.permute.xlu0 %1182 }
 0x789   : > { %v2733_v34 = vsel %vm505_vm14, %v1189_v32, %v1191_v30 }
 0x78c   : > { %v1229_v35 = vpop.permute.xlu1 %1228  ;;  %v2735_v36 = vpop.permute.xlu0 %1226 }
 0x78d   : > { %v2739_v37 = vsel %vm524_vm15, %v2735_v36, %v1229_v35  ;;  %v897_v35 = vld [vmem:[%s2904_s2 + $0x10] sm:$0xff] }
 0x790   : > { %v955_v38 = vpop.permute.xlu1 %954  ;;  %v953_v39 = vpop.permute.xlu0 %952 }
 0x791   : > { %v962_v40 = vsel %vm364_vm13, %v951_v56, %v953_v39  ;;  %v963_v41 = vsel %vm364_vm13, %v953_v39, %v955_v38 }
 0x792   : > { %970 = vst [vmem:[#allocation3 + $0x20] sm:$0xff] %v962_v40  ;;  %971 = vst [vmem:[#allocation3 + $0x28] sm:$0xff] %v963_v41  ;;  %v1929_v42 = vpack.c.bf16 %v965_v54, %v963_v41  ;;  %v1931_v43 = vpack.c.bf16 %v964_v57, %v962_v40 }
 0x794   : > { %v991_v45 = vpop.permute.xlu1 %990  ;;  %v989_v50 = vpop.permute.xlu0 %988  ;;  %1930 = vmatprep.subr.bf16.mxu1 %v1929_v42 }
 0x795   : > { %v998_v10 = vsel %vm387_vm9, %v987_v48, %v989_v50  ;;  %v999_v20 = vsel %vm387_vm9, %v989_v50, %v991_v45  ;;  %1932 = vmatpush1.bf16.msra.mxu1 %v1931_v43 }
 0x796   : > { %v1006_v51 = vsel %vm2544_vm10, %v998_v10, 0.0  ;;  %v1007_v52 = vsel %vm2550_vm11, %v999_v20, 0.0  ;;  %v2111_v58 = vpack.c.bf16 %v1001_v47, %v999_v20  ;;  %v2114_v60 = vpack.c.bf16 %v1000_v61, %v998_v10 }
 0x797   : > { %1010 = vst [vmem:[#allocation3 + $0x40] sm:$0xff] %v1006_v51  ;;  %1011 = vst [vmem:[#allocation3 + $0x48] sm:$0xff] %v1007_v52 }
 0x798   : > { %v1031_v53 = vpop.permute.xlu1 %1030  ;;  %v1029_v55 = vpop.permute.xlu0 %1028  ;;  %2112 = vmatprep.subr.msk.bf16.mxu1 %vm2754_vm4, %v2111_v58 }
 0x799   : > { %v1038_v54 = vsel %vm408_vm7, %v1027_v3, %v1029_v55  ;;  %v1039_v56 = vsel %vm408_vm7, %v1029_v55, %v1031_v53  ;;  %2115 = vmatpush1.bf16.msk.msra.mxu1 %vm2763_vm5, %v2114_v60 }
 0x79a   : > { %v2117_v49 = vpack.c.bf16 %v2706_v63, %v1039_v56  ;;  %v2120_v19 = vpack.c.bf16 %v2709_v5, %v1038_v54 }
 0x79c   : > { %v1071_v21 = vpop.permute.xlu1 %1070  ;;  %v1069_v48 = vpop.permute.xlu0 %1068  ;;  %2118 = vmatprep.subr.msk.bf16.mxu1 %vm2626_vm0, %v2117_v49 }
 0x79d   : > { %v1078_v62 = vsel %vm435_vm8, %v1067_v13, %v1069_v48  ;;  %v1079_v47 = vsel %vm435_vm8, %v1069_v48, %v1071_v21  ;;  %2121 = vmatpush1.bf16.msk.msra.mxu1 %vm2635_vm2, %v2120_v19 }
 0x79e   : > { %v1941_v61 = vpack.c.bf16 %v2712_v11, %v1079_v47  ;;  %v1943_v7 = vpack.c.bf16 %v2715_v15, %v1078_v62 }
 0x7a0   : > { %v1107_v1 = vpop.permute.xlu1 %1106  ;;  %v1105_v3 = vpop.permute.xlu0 %1104  ;;  %1942 = vmatprep.subr.bf16.mxu1 %v1941_v61  ;;  %v2101_v61 = vld [vmem:[%s2906_s4] sm:$0xff] }
 0x7a1   : > { %v1114_v8 = vsel %vm454_vm12, %v1103_v24, %v1105_v3  ;;  %v1115_v12 = vsel %vm454_vm12, %v1105_v3, %v1107_v1  ;;  %1944 = vmatpush1.bf16.msra.mxu1 %v1943_v7  ;;  %v2102_v1 = vld [vmem:[%s2906_s4 + $0x8] sm:$0xff] }
 0x7a2   : > { %v2123_v17 = vpack.c.bf16 %v2718_v18, %v1115_v12  ;;  %v2126_v11 = vpack.c.bf16 %v2721_v25, %v1114_v8  ;;  %v2103_v12 = vld [vmem:[%s2458_s10] sm:$0xff]  ;;  %s272_s10 = sand.u32 1, %s2258_s22  }
 0x7a3   : > { %s1829_s18 = sshll.u32 %s272_s10, 5 }
 0x7a4   : > { %v1147_v63 = vpop.permute.xlu1 %1146  ;;  %v1145_v13 = vpop.permute.xlu0 %1144  ;;  %2124 = vmatprep.subr.msk.bf16.mxu1 %vm2754_vm4, %v2123_v17  ;;  %s274_s19 = scalar_lea.vmem [#allocation9], %s1829_s18 }
 0x7a5   : > { %v1154_v16 = vsel %vm481_vm6, %v1143_v27, %v1145_v13  ;;  %v1155_v5 = vsel %vm481_vm6, %v1145_v13, %v1147_v63  ;;  %2127 = vmatpush1.bf16.msk.msra.mxu1 %vm2763_vm5, %v2126_v11  ;;  %v1589_v63 = vld [vmem:[%s2905_s3] sm:$0xff]  ;;  %vm1599_vm6 = vcmask 31744   ;;  %s1737_s20 = sshll.u32 %s274_s19, 4  ;;  %s2854_s20 = int_to_ptr.vmem [resolvable:$true] %s1737_s20 }
 0x7a6   : > { %v2129_v9 = vpack.c.bf16 %v2724_v14, %v1155_v5  ;;  %v2132_v18 = vpack.c.bf16 %v2727_v28, %v1154_v16  ;;  %s2196_s25 = scalar_lea.vmem %s2854_s20, 512  ;;  %p2203_p4 = scmp.lt.s32.totalorder %s2854_s20, %s2201_s12 }
 0x7a7   : > { %p2197_p12 = scmp.ne.s32.totalorder %s2854_s20, %s2196_s25  ;;  %p2204_p7 = scmp.lt.s32.totalorder %s2202_s14, %s2196_s25 }
 0x7a8   : > { %v1187_v15 = vpop.permute.xlu1 %1186  ;;  %v1185_v22 = vpop.permute.xlu0 %1184  ;;  %2130 = vmatprep.subr.msk.bf16.mxu1 %vm2626_vm0, %v2129_v9  ;;  %v2287_v9 = vmov 6  }
 0x7a9   : > { %v1194_v24 = vsel %vm505_vm14, %v1183_v33, %v1185_v22  ;;  %v1195_v4 = vsel %vm505_vm14, %v1185_v22, %v1187_v15  ;;  %2133 = vmatpush1.bf16.msk.msra.mxu1 %vm2635_vm2, %v2132_v18  ;;  %v895_v33 = vld [vmem:[%s2904_s2] sm:$0xff]  ;;  %p2198_p2 = pnand %p2197_p12, %p2937_p1  ;;  %p2205_p8 = por %p2204_p7, %p2203_p4 }
 0x7aa   : > { %v1953_v25 = vpack.c.bf16 %v2730_v31, %v1195_v4  ;;  %v1955_v29 = vpack.c.bf16 %v2733_v34, %v1194_v24  ;;  %v898_v34 = vld [vmem:[%s2904_s2 + $0x18] sm:$0xff] }
 0x7ab   : > { %p2199_p3 = pneg %p2198_p2 }
 0x7ac   : > { %v1223_v26 = vpop.permute.xlu1 %1222  ;;  %v1221_v27 = vpop.permute.xlu0 %1220  ;;  %1954 = vmatprep.subr.bf16.mxu1 %v1953_v25 }
 0x7ad   : > { %v1231_v30 = vsel %vm524_vm15, %v1221_v27, %v1223_v26  ;;  %1956 = vmatpush1.bf16.msra.mxu1 %v1955_v29  ;;  %p2206_p11 = pnand %p2205_p8, %p2199_p3 }
 0x7ae   : > { %v2135_v46 = vpack.c.bf16 %v2739_v37, %v1231_v30 }
 0x7b0   : > { %v1225_v32 = vpop.permute.xlu1 %1224  ;;  %v1219_v14 = vpop.permute.xlu0 %1218  ;;  %2136 = vmatprep.subr.msk.bf16.mxu1 %vm2754_vm4, %v2135_v46 }
 0x7b1   : > { %v1232_v44 = vsel %vm524_vm15, %v1225_v32, %v2735_v36  ;;  %v1230_v28 = vsel %vm524_vm15, %v1219_v14, %v1221_v27 }
 0x7b2   : > { %v2138_v31 = vpack.c.bf16 %v1232_v44, %v1230_v28 }
 0x7b4   : > { %2139 = vmatpush1.bf16.msk.msra.mxu1 %vm2763_vm5, %v2138_v31 }
 0x7b7   : > { %1361 = vmatmul.mubr.f32.vlgmr.msra.gmra.mrb[0].mxu1 %v895_v33 }
 0x7b8   : > { %1845 = vmatprep.mubr.msk.f32.mxu1 %vm650_vm3, %v898_v34 }
 0x7bb   : > { %1367 = vmatmul.mubr.f32.gmra.mrb[2].mxu1 %v897_v35 }
 0x7c1   : > { %v1284_v36 = vpop.permute.xlu0 %1283  ;;  %v1288_v41 = vpop.permute.xlu1 %1287 }
 0x88a   : > { %v1362_v37 = vpop.f32.mrb[0].mxu1 }
 0x88b   : > { %v1364_v38 = vpop.f32.mrb[1].mxu1  ;;  %v1363_v39 = vadd.f32 %v1362_v37, %v1284_v36 }
 0x88c   : > { %v1365_v40 = vadd.f32 %v1364_v38, %v1284_v36 }
 0x88e   : > { %v1368_v42 = vpop.f32.mrb[2].mxu1  ;;  %v1373_v43 = vadd.f32 %v1365_v40, %v1363_v39 }
 0x88f   : > { %v1369_v45 = vadd.f32 %v1368_v42, %v1288_v41  ;;  %v1370_v50 = vpop.f32.mrb[3].mxu1 }
 0x890   : > { %v1371_v10 = vadd.f32 %v1370_v50, %v1288_v41  ;;  %1374 = vadd.xlane.f32.xlu1 %v1373_v43 }
 0x892   : > { %v1376_v20 = vadd.f32 %v1371_v10, %v1369_v45 }
 0x894   : > { %1377 = vadd.xlane.f32.xlu0 %v1376_v20 }
 0x91d   : > { %v1375_v51 = vpop.xlane.xlu1 %1374 }
 0x921   : > { %v1378_v52 = vpop.xlane.xlu0 %1377 }
 0x922   : > { %v1961_v53 = vpack.c.bf16 %v1378_v52, %v1375_v51 }
 0x924   : > { %1962 = vmatprep.subr.bf16.mxu0 %v1961_v53 }
 0x925   : > { %1964 = vmatpush3.bf16.msra.mxu0 %v1961_v53 }
 0x928   : > { %1900 = vmatmul.mubr.msk.f32.vlgmr.msra.gmra.mrb[8].mxu0 %vm650_vm3, %v2583_v6 }
 0x929   : > { %1906 = vmatprep.mubr.msk.f32.mxu0 %vm650_vm3, %v2579_v23 }
 0x9fb   : > { %v1901_v55 = vpop.f32.mrb[8].mxu0 }
 0x9fc   : > { %1461 = vperm.xlu1 %2056, %v1901_v55   ;;  %v1445_v54 = vpop.f32.mrb[9].mxu0 }
 0x9fd   : > { %1456 = vperm.xlu0 %2055, %v1445_v54  }
 0xa7b   : > { %v1462_v56 = vpop.permute.xlu1 %1461 }
 0xa7c   : > { %v2822_v57 = vsub.f32 %v1369_v45, %v1462_v56  ;;  %v2824_v58 = vsub.f32 %v1371_v10, %v1462_v56  ;;  %v1457_v59 = vpop.permute.xlu0 %1456 }
 0xa7d   : > { %v1464_v60 = vsub.f32 %v1363_v39, %v1457_v59  ;;  %v1465_v21 = vsub.f32 %v1365_v40, %v1457_v59 }
 0xa7e   : > { %v1470_v48 = vmul.f32 %v2822_v57, %v2822_v57  ;;  %v1471_v62 = vmul.f32 %v2824_v58, %v2824_v58 }
 0xa7f   : > { %v1468_v47 = vmul.f32 %v1464_v60, %v1464_v60  ;;  %v1469_v23 = vmul.f32 %v1465_v21, %v1465_v21 }
 0xa80   : > { %v1475_v49 = vadd.f32 %v1471_v62, %v1470_v48 }
 0xa81   : > { %v1472_v19 = vadd.f32 %v1469_v23, %v1468_v47 }
 0xa82   : > { %1476 = vadd.xlane.f32.xlu0 %v1475_v49 }
 0xa83   : > { %1473 = vadd.xlane.f32.xlu1 %v1472_v19 }
 0xa94   : > { %1555 = vrot.lane.b32.xlu1 %v2101_v61, %s2285_s15 }
 0xa98   : > { %1557 = vrot.lane.b32.xlu1 %v2102_v1, %s2285_s15  ;;  %s2861_s15 = scalar_lea.sflag [#allocation6], %s272_s10 }
 0xb0f   : > { %v1477_v3 = vpop.xlane.xlu0 %1476 }
 0xb10   : > { %v1474_v7 = vpop.xlane.xlu1 %1473 }
 0xb11   : > { %v1965_v8 = vpack.c.bf16 %v1477_v3, %v1474_v7 }
 0xb13   : > { %1966 = vmatprep.subr.bf16.mxu0 %v1965_v8 }
 0xb14   : > { %1968 = vmatpush3.bf16.msra.mxu0 %v1965_v8  ;;  %v1556_v17 = vpop.permute.xlu1 %1555 }
 0xb15   : > { %1850 = vmatprep.subr.msk.mxu0 %vm560_vm1, %v2462_v2  ;;  %v1590_v2 = vld [vmem:[%s2905_s3 + $0x8] sm:$0xff] }
 0xb17   : > { %1907 = vmatmul.mubr.msk.f32.vlgmr.msra.gmra.mrb[10].mxu0 %vm650_vm3, %v2583_v6 }
 0xb18   : > { %1851 = vmatpush1.msk.msra.mxu0 %vm560_vm1, %v2103_v12  ;;  %1674 = vmatprep.mubr.f32.mxu0 %v2272_v0  ;;  %v1558_v11 = vpop.permute.xlu1 %1557 }
 0xb1b   : > { %1852 = vmatmul.mubr.msk.f32.vlgmr.msra.gmra.mrb[12].mxu0 %vm1599_vm6, %v1589_v63 }
 0xb1c   : > { %1680 = vmatprep.mubr.f32.mxu0 %v2272_v0  ;;  %v2286_v0 = vmov 5  }
 0xb1f   : > { %1853 = vmatmul.mubr.msk.f32.gmra.mrb[14].mxu0 %vm1599_vm6, %v1590_v2 }
 0xbea   : > { %v1908_v13 = vpop.f32.mrb[10].mxu0 }
 0xbeb   : > { %v1550_v6 = vadd.f32 1e-05, %v1908_v13  ;;  %v1544_v16 = vpop.f32.mrb[11].mxu0 }
 0xbec   : > { %v1545_v5 = vadd.f32 1e-05, %v1544_v16 }
 0xbed   : > { %2081 = vrsqrt.f32 %v1550_v6 }
 0xbee   : > { %2083 = vrsqrt.f32 %v1545_v5  ;;  %v1676_v18 = vpop.f32.mrb[12].mxu0 }
 0xbef   : > { %v1678_v25 = vpop.f32.mrb[13].mxu0 }
 0xbf2   : > { %v1682_v26 = vpop.f32.mrb[14].mxu0 }
 0xbf3   : > { %v1684_v27 = vpop.f32.mrb[15].mxu0 }
 0xbf7   : > { %v2082_v15 = vpop.eup %2081 }
 0xbf8   : > { %v2084_v22 = vpop.eup %2083  ;;  %v1562_v24 = vmul.f32 %v2082_v15, %v1558_v11 }
 0xbf9   : > { %v1561_v4 = vmul.f32 %v2084_v22, %v1556_v17 }
 0xbfa   : > { %1570 = vperm.xlu1 %2056, %v1562_v24  }
 0xbfb   : > { %1565 = vperm.xlu0 %2055, %v1561_v4  }
 0xbfe   : > { %2057 = vset.pattern.permute.xlu1 %v2286_v0 }
 0xbff   : > { %1578 = vperm.xlu1 %2057, %v2101_v61   ;;  %2059 = vset.pattern.permute.xlu0 %v2287_v9 }
 0xc03   : > { %1582 = vperm.xlu1 %2057, %v2102_v1  }
 0xc07   : > { %2058 = vset.pattern.permute.xlu1 %v2287_v9 }
 0xc08   : > { %1592 = vperm.xlu1 %2058, %v2101_v61  }
 0xc0c   : > { %1596 = vperm.xlu1 %2058, %v2102_v1  }
 0xc79   : > { %v1571_v29 = vpop.permute.xlu1 %1570 }
 0xc7a   : > { %v1566_v14 = vpop.permute.xlu0 %1565  ;;  %v1575_v36 = vmul.f32 %v1571_v29, %v2822_v57  ;;  %v1576_v37 = vmul.f32 %v1571_v29, %v2824_v58 }
 0xc7b   : > { %v1573_v44 = vmul.f32 %v1566_v14, %v1464_v60  ;;  %v1574_v28 = vmul.f32 %v1566_v14, %v1465_v21 }
 0xc7e   : > { %v1579_v30 = vpop.permute.xlu1 %1578 }
 0xc7f   : > { %v1585_v31 = vadd.f32 %v1579_v30, %v1573_v44  ;;  %v1586_v33 = vadd.f32 %v1579_v30, %v1574_v28 }
 0xc82   : > { %v1583_v32 = vpop.permute.xlu1 %1582 }
 0xc83   : > { %v1587_v40 = vadd.f32 %v1583_v32, %v1575_v36  ;;  %v1588_v41 = vadd.f32 %v1583_v32, %v1576_v37 }
 0xc87   : > { %v1593_v46 = vpop.permute.xlu1 %1592 }
 0xc88   : > { %v1677_v34 = vadd.f32 %v1676_v18, %v1593_v46  ;;  %v1679_v35 = vadd.f32 %v1678_v25, %v1593_v46 }
 0xc8a   : > { %v1687_v38 = vadd.f32 %v1677_v34, %v1585_v31  ;;  %v1688_v39 = vadd.f32 %v1679_v35, %v1586_v33 }
 0xc8b   : > { %v1597_v42 = vpop.permute.xlu1 %1596 }
 0xc8c   : > { %v1854_v43 = vmul.f32 -1.442695, %v1687_v38  ;;  %v1855_v45 = vmul.f32 -1.442695, %v1688_v39  ;;  %v1683_v50 = vadd.f32 %v1682_v26, %v1597_v42  ;;  %v1685_v10 = vadd.f32 %v1684_v27, %v1597_v42 }
 0xc8e   : > { %2085 = vpow2.f32 %v1854_v43  ;;  %v1689_v20 = vadd.f32 %v1683_v50, %v1587_v40  ;;  %v1690_v51 = vadd.f32 %v1685_v10, %v1588_v41 }
 0xc8f   : > { %2087 = vpow2.f32 %v1855_v45 }
 0xc90   : > { %v1856_v52 = vmul.f32 -1.442695, %v1689_v20  ;;  %v1857_v53 = vmul.f32 -1.442695, %v1690_v51 }
 0xc92   : > { %2089 = vpow2.f32 %v1856_v52 }
 0xc93   : > { %2091 = vpow2.f32 %v1857_v53 }
 0xc98   : > { %v2086_v55 = vpop.eup %2085 }
 0xc99   : > { %v2088_v54 = vpop.eup %2087  ;;  %v1703_v56 = vadd.f32 1.0, %v2086_v55 }
 0xc9a   : > { %v1704_v57 = vadd.f32 1.0, %v2088_v54 }
 0xc9b   : > { %2093 = vrcp.f32 %v1703_v56 }
 0xc9c   : > { %v2090_v58 = vpop.eup %2089  ;;  %2095 = vrcp.f32 %v1704_v57 }
 0xc9d   : > { %v2092_v59 = vpop.eup %2091  ;;  %v1705_v60 = vadd.f32 1.0, %v2090_v58 }
 0xc9e   : > { %v1706_v21 = vadd.f32 1.0, %v2092_v59 }
 0xc9f   : > { %2097 = vrcp.f32 %v1705_v60 }
 0xca0   : > { %2099 = vrcp.f32 %v1706_v21 }
 0xca5   : > { %v2094_v48 = vpop.eup %2093 }
 0xca6   : > { %v2096_v62 = vpop.eup %2095  ;;  %v1715_v47 = vmul.f32 %v2094_v48, %v1687_v38 }
 0xca7   : > { %v1716_v23 = vmul.f32 %v2096_v62, %v1688_v39 }
 0xca8   : > { %1719 = vst [vmem:[%s274_s19] sm:$0xff] %v1715_v47 }
 0xca9   : > { %v2098_v49 = vpop.eup %2097  ;;  %1720 = vst [vmem:[%s274_s19 + $0x8] sm:$0xff] %v1716_v23 }
 0xcaa   : > { %v2100_v19 = vpop.eup %2099  ;;  %v1717_v61 = vmul.f32 %v2098_v49, %v1689_v20 }
 0xcab   : > { %v1718_v1 = vmul.f32 %v2100_v19, %v1690_v51 }
 0xcac   : > { %1721 = vst [vmem:[%s274_s19 + $0x10] sm:$0xff] %v1717_v61 }
 0xcad   : > { %1722 = vst [vmem:[%s274_s19 + $0x18] sm:$0xff] %v1718_v1 }
 0xcae   : > { %2209 = shalt.err (!%p2206_p11)
}
 0xcaf   : > { %s2210_s29 = scalar_lea.hbm %s2859_s13, 512  ;;  %s2214_s10 = scalar_lea.hbm %s2908_s6, 1024 }
 0xcb0   : > { %p2211_p13 = scmp.ne.s32.totalorder %s2859_s13, %s2210_s29  ;;  %p2215_p6 = scmp.lt.u32.totalorder %s2859_s13, %s2908_s6 }
 0xcb1   : > { %p2216_p9 = scmp.lt.u32.totalorder %s2214_s10, %s2210_s29  ;;  %p2218_p12 = scmp.lt.u32.totalorder %s2210_s29, %s2859_s13 }
 0xcb2   : > { %p2212_p5 = pnand %p2211_p13, %p2937_p1 }
 0xcb3   : > { %p2217_p10 = por %p2216_p9, %p2215_p6 }
 0xcb4   : > { %p2213_p0 = pneg %p2212_p5 }
 0xcb5   : > { %p2219_p2 = por %p2218_p12, %p2217_p10 }
 0xcb7   : > { %p2220_p3 = pnand %p2219_p2, %p2213_p0 }
 0xcb9   : > { %2223 = shalt.err (!%p2220_p3)
}
 0xcba   : > { %s2289_s26 = smov 256   ;;  %s2290_s28 = smov 16  }
 0xcbb   : > { %1977 = dma.vmem_to_hbm [thread:$0]  (%p2937_p1), %s2854_s20, 512, %s2859_s13, %s2861_s15, %s2289_s26, %s2289_s26, %s2290_s28  }
 0xcbc PF: > { %p1994_p4 = scmp.ge.s32.totalorder %s2266_s24, 2  ;;  %s1752_s11 = sand.u32 1, %s2254_s21  }
 0xcbd   : > { %p2938_p7 = scmp.ne.s32.totalorder %s2913_s8, 0  ;;  %s1753_s25 = scalar_lea.sflag [#allocation6], %s1752_s11 }
 0xcbf   : > { %p1987_p8 = pnand %p1994_p4, %p2938_p7 }
 0xcc1   : > { %2249 = dma.done.wait (!%p1987_p8), %s1753_s25, 512  }
 0xcc2   : > { %2251 = vsyncadd (!%p1987_p8), %s1753_s25, 4294966784  ;;  %p18_p11 = scmp.ge.s32.totalorder %s2351_s27, 4   ;;  %s2939_s21 = smov %s2258_s22 }
 0xcc3   : > { %s2940_s22 = smov %s2262_s23  ;;  %s2941_s23 = smov %s2362_s30 }
 0xcc4   : > { %s2942_s24 = smov %s2351_s27  ;;  %20 = sbr.rel (!%p18_p11) target bundleno = 5 (0x5), region = 88 }
 0xccb   :  { %1758 = vsyncpa [#allocation5], 1 }
 0xccc   :  { %1760 = vsyncpa [#allocation5 + $0x1], 1 }
 0xccd   :  { %1761 = vsyncpa [#allocation8], 1 }
 0xcce   :  { %1762 = vsyncpa [#allocation6], 1 }
 0xccf   :  { %1764 = vsyncpa [#allocation6 + $0x1], 1 }

</bundles_post_ra>
